<compile_context>
chip_gen: v6e
topology: v6e:2x2x1
jax: 0.10.0
libtpu: 0.0.40
codegen_flags: <defaults>
</compile_context>

<pallas_src>
import math
import functools

import jax
import jax.numpy as jnp
from jax.experimental import pallas as pl
from jax.experimental.pallas import tpu as pltpu


# ----------------------------------------------------------------------------
# Fused forward kernel: grid axis = transformer layer index (sequential).
# ----------------------------------------------------------------------------
def _fused_forward_kernel(
    # ---- constant (layer-independent) inputs ----
    xflat_ref,   # [N*Tx, Cx]   bf16  X transposed to time-major rows
    gf_ref,      # [N, te]      f32   Gaussian-Fourier features of T[:, 0]
    pos_ref,     # [S, d_pos]   f32   positional-encoding table
    tew_ref,     # [te, te]     bf16  treatment-embedder Linear weight
    teb_ref,     # [1, te]      f32   treatment-embedder Linear bias
    wip_ref,     # [d_pos, D]   bf16  input_mapping rows for pos channels
    wix_ref,     # [Cx, D]      bf16  input_mapping rows for X channels
    wit_ref,     # [te, D]      bf16  input_mapping rows for Tembed channels
    inb_ref,     # [1, D]       f32   input_mapping bias
    wout_ref,    # [D, OUT_PAD] bf16  output_layer weight (lane-padded)
    bout_ref,    # [1, OUT_PAD] f32   output_layer bias   (lane-padded)
    # ---- per-layer inputs (stacked on a leading L axis, squeezed here) ----
    wqkv_ref,    # [D, 3D]  bf16  folded (map_embed o {Q,K,V}), scale in Q part
    bqkv_ref,    # [1, 3D]  f32
    wo_ref, bo_ref,          # attention output projection
    g1_ref, be1_ref,         # LayerNorm1
    w1_ref, b1_ref,          # FF linear1
    w2_ref, b2_ref,          # FF linear2
    g2_ref, be2_ref,         # LayerNorm2
    # ---- output ----
    o_ref,       # [N*S, OUT_PAD] f32
    # ---- scratch ----
    x_vmem,      # [N*S, D] f32 : activations resident across the layer grid axis
    mask_vmem,   # [S, S]   f32 : additive attention mask, built once at layer 0
    *, N, S, Tx, D, H,
):
    f32 = jnp.float32
    bf16 = jnp.bfloat16
    hd = D // H
    M = N * S
    l = pl.program_id(0)

    # --------------------------------------------------------------------
    # Prologue at layer 0: mask + treatment embed + input projection.
    # --------------------------------------------------------------------
    @pl.when(l == 0)
    def _prologue():
        # additive attention mask (get_src_mask semantics), built once:
        #   query a < Tx  -> keys b with b < Tx and b <= a (causal over X)
        #   query a >= Tx -> all keys
        qi = jax.lax.broadcasted_iota(jnp.int32, (S, S), 0)
        ki = jax.lax.broadcasted_iota(jnp.int32, (S, S), 1)
        allowed = (qi >= Tx) | ((ki < Tx) & (ki <= qi))
        mask_vmem[...] = jnp.where(allowed, 0.0, -1e9).astype(f32)

        # treatment embedder tail: Linear(te, te) -> swish
        teb = jnp.dot(gf_ref[...].astype(bf16), tew_ref[...],
                      preferred_element_type=f32) + teb_ref[...]
        teb = teb * jax.nn.sigmoid(teb)                                 # [N, te]

        # decomposed input_mapping (channel groups of x_full: pos | X | Tembed)
        # bias folded into the pos contribution (present for every row).
        x_pos = jnp.dot(pos_ref[...].astype(bf16), wip_ref[...],
                        preferred_element_type=f32) + inb_ref[...]      # [S, D]
        x_obs = jnp.dot(xflat_ref[...], wix_ref[...],
                        preferred_element_type=f32)                     # [N*Tx, D]
        x_trt = jnp.dot(teb.astype(bf16), wit_ref[...],
                        preferred_element_type=f32)                     # [N, D]

        # direct slice stores into the resident activation buffer (no concats,
        # no zeros tail).  N is a tiny static int; Tx/S are sublane-aligned.
        for b in range(N):
            x_vmem[pl.ds(b * S, Tx), :] = (
                x_obs[b * Tx:(b + 1) * Tx, :] + x_trt[b:b + 1, :] + x_pos[:Tx, :])
            x_vmem[pl.ds(b * S + Tx, S - Tx), :] = x_pos[Tx:, :]

    # --------------------------------------------------------------------
    # TransformerEncoderLayer l
    # --------------------------------------------------------------------
    x = x_vmem[...]                                                     # [M, D] f32
    x_bf = x.astype(bf16)

    # fused, pre-folded Q|K|V projection: one [M,D]x[D,3D] MXU matmul
    qkv = jnp.dot(x_bf, wqkv_ref[...],
                  preferred_element_type=f32) + bqkv_ref[...]           # [M, 3D]
    qkv_bf = qkv.astype(bf16)

    # hoisted mask broadcast (broadcast_in_dim is not CSE'd across heads)
    neg = jnp.broadcast_to(mask_vmem[...], (N, S, S))                   # [N, S, S]

    head_outs = []
    for h in range(H):                            # H static & tiny; rank-3 einsums
        q_h = qkv_bf[:, h * hd:(h + 1) * hd].reshape(N, S, hd)
        k_h = qkv_bf[:, D + h * hd:D + (h + 1) * hd].reshape(N, S, hd)
        v_h = qkv_bf[:, 2 * D + h * hd:2 * D + (h + 1) * hd].reshape(N, S, hd)
        s_ = jnp.einsum('bqd,bkd->bqk', q_h, k_h,
                        preferred_element_type=f32) + neg               # scale folded in Wq
        s_ = s_ - jnp.max(s_, axis=-1, keepdims=True)
        p = jnp.exp(s_)
        p = p * pl.reciprocal(jnp.sum(p, axis=-1, keepdims=True), approx=True)
        o_h = jnp.einsum('bqk,bkd->bqd', p.astype(bf16), v_h,
                         preferred_element_type=f32)                    # [N, S, hd]
        head_outs.append(o_h.reshape(M, hd))
    attn = jnp.dot(jnp.concatenate(head_outs, axis=-1).astype(bf16),
                   wo_ref[...], preferred_element_type=f32) + bo_ref[...]

    # residual + LayerNorm1 (f32, reuse (y - mu) temporary)
    y = x + attn
    mu = jnp.mean(y, axis=-1, keepdims=True)
    d1 = y - mu
    var = jnp.mean(d1 * d1, axis=-1, keepdims=True)
    y = d1 * jax.lax.rsqrt(var + 1e-5) * g1_ref[...] + be1_ref[...]

    # feed-forward (bf16 matmuls, f32 elementwise)
    h1 = jnp.maximum(
        jnp.dot(y.astype(bf16), w1_ref[...],
                preferred_element_type=f32) + b1_ref[...], 0.0)
    ff = jnp.dot(h1.astype(bf16), w2_ref[...],
                 preferred_element_type=f32) + b2_ref[...]

    # residual + LayerNorm2 (f32)
    z = y + ff
    mu2 = jnp.mean(z, axis=-1, keepdims=True)
    d2 = z - mu2
    var2 = jnp.mean(d2 * d2, axis=-1, keepdims=True)
    z = d2 * jax.lax.rsqrt(var2 + 1e-5) * g2_ref[...] + be2_ref[...]

    x_vmem[...] = z

    # --------------------------------------------------------------------
    # Epilogue at the last layer: lane-dense (padded) output projection.
    # --------------------------------------------------------------------
    @pl.when(l == pl.num_programs(0) - 1)
    def _epilogue():
        o_ref[...] = jnp.dot(z.astype(bf16), wout_ref[...],
                             preferred_element_type=f32) + bout_ref[...]


# ----------------------------------------------------------------------------
# Parameter init (deterministic, synthetic; shapes follow the PyTorch __init__).
# Linear weights stored as [in, out].  map_embed is folded into Q/K/V in f32,
# the 1/sqrt(hd) score scale is folded into Q, Q|K|V are fused column-wise,
# matmul weights cast to bf16, per-layer weights stacked on a leading L axis,
# and the output projection is zero-padded to a lane-dense width.
# ----------------------------------------------------------------------------
def init_params(key, cfg):
    Cx = cfg["input_long_size"]
    D = cfg["hidden_dim"]
    F = cfg["ff_dim"]
    d_pos = cfg["d_pos_embed"]
    te = cfg["t_embed"]
    recon = cfg["reconstruction_size"]
    L = cfg["trans_layers"]
    H = cfg["nheads"]
    hd = D // H
    d_in = Cx + d_pos + te
    recon_pad = ((recon + 127) // 128) * 128

    keys = iter(jax.random.split(key, 1024))

    def w(shape, scale=0.1):
        return (scale * jax.random.normal(next(keys), shape)).astype(jnp.float32)

    num_ts = d_pos // 2
    log_inc = math.log(float(cfg["max_pos_encoding"]) / 1.0) / float(num_ts - 1)
    inv_timescales = jnp.exp(jnp.arange(num_ts, dtype=jnp.float32) * (-log_inc))

    in_w = w((d_in, D))   # channel order of x_full: [pos | X | Tembed]
    out_w = w((D, recon))
    out_b = w((1, recon))
    out_w_pad = jnp.zeros((D, recon_pad), jnp.float32).at[:, :recon].set(out_w)
    out_b_pad = jnp.zeros((1, recon_pad), jnp.float32).at[:, :recon].set(out_b)

    params = {
        "gf_w": (30.0 * jax.random.normal(next(keys), (1, te // 2))).astype(jnp.float32),
        "te_w": w((te, te)).astype(jnp.bfloat16),
        "te_b": w((1, te)),
        "inv_timescales": inv_timescales.reshape(1, num_ts),
        "in_w_pos": in_w[:d_pos].astype(jnp.bfloat16),
        "in_w_x": in_w[d_pos:d_pos + Cx].astype(jnp.bfloat16),
        "in_w_te": in_w[d_pos + Cx:].astype(jnp.bfloat16),
        "in_b": w((1, D)),
        "out_w": out_w_pad.astype(jnp.bfloat16),
        "out_b": out_b_pad,
        "recon": recon,
    }

    scale = float(hd) ** -0.5
    stacks = {k: [] for k in ["wqkv", "bqkv", "wo", "bo", "g1", "be1",
                              "w1", "b1", "w2", "b2", "g2", "be2"]}
    for _ in range(L):
        # raw PyTorch-style per-layer params (f32)
        wm, bm = w((D, D)), w((1, D))
        wq, bq = w((D, D)), w((1, D))
        wk, bk = w((D, D)), w((1, D))
        wv, bv = w((D, D)), w((1, D))
        # fold map_embed into Q/K/V (f32), fold score scale into Q, fuse Q|K|V
        wq_f = (wm @ wq) * scale
        bq_f = (bm @ wq + bq) * scale
        wk_f = wm @ wk
        bk_f = bm @ wk + bk
        wv_f = wm @ wv
        bv_f = bm @ wv + bv
        stacks["wqkv"].append(jnp.concatenate([wq_f, wk_f, wv_f], axis=1))
        stacks["bqkv"].append(jnp.concatenate([bq_f, bk_f, bv_f], axis=1))
        stacks["wo"].append(w((D, D))); stacks["bo"].append(w((1, D)))
        stacks["g1"].append(jnp.ones((1, D), jnp.float32))
        stacks["be1"].append(jnp.zeros((1, D), jnp.float32))
        stacks["w1"].append(w((D, F))); stacks["b1"].append(w((1, F)))
        stacks["w2"].append(w((F, D))); stacks["b2"].append(w((1, D)))
        stacks["g2"].append(jnp.ones((1, D), jnp.float32))
        stacks["be2"].append(jnp.zeros((1, D), jnp.float32))

    mat_keys = {"wqkv", "wo", "w1", "w2"}
    for k, v in stacks.items():
        arr = jnp.stack(v, axis=0)
        params[k] = arr.astype(jnp.bfloat16) if k in mat_keys else arr
    return params


# ----------------------------------------------------------------------------
# Full TransformerModel.forward (one fused pallas_call)
# ----------------------------------------------------------------------------
def transformer_model_forward(X, T, params, cfg):
    N, Cx, Tx = X.shape
    S = 2 * Tx
    D = cfg["hidden_dim"]
    H = cfg["nheads"]
    recon = cfg["reconstruction_size"]
    L = cfg["trans_layers"]
    M = N * S
    recon_pad = params["out_w"].shape[-1]

    # Tiny XLA-side glue: sin/cos tables (<1 KiB) and input layout only.
    Xflat = jnp.transpose(X.astype(jnp.float32), (0, 2, 1)).reshape(N * Tx, Cx)
    Xflat = Xflat.astype(jnp.bfloat16)

    t0 = T[:, :1].astype(jnp.float32)                                    # [N, 1]
    xp = t0 * params["gf_w"] * (2.0 * math.pi)                           # [N, te/2]
    gf = jnp.concatenate([jnp.sin(xp), jnp.cos(xp)], axis=-1)            # [N, te]

    times = jnp.arange(S, dtype=jnp.float32)[:, None]                    # [S, 1]
    scaled = times * params["inv_timescales"]                            # [S, d_pos/2]
    pos = jnp.concatenate([jnp.sin(scaled), jnp.cos(scaled)], axis=-1)   # [S, d_pos]

    const_args = (
        Xflat, gf, pos,
        params["te_w"], params["te_b"],
        params["in_w_pos"], params["in_w_x"], params["in_w_te"], params["in_b"],
        params["out_w"], params["out_b"],
    )
    layer_keys = ("wqkv", "bqkv", "wo", "bo", "g1", "be1",
                  "w1", "b1", "w2", "b2", "g2", "be2")
    layer_args = tuple(params[k] for k in layer_keys)

    def const_spec(a):
        nd = a.ndim
        return pl.BlockSpec(a.shape, lambda l, nd=nd: (0,) * nd)

    def layer_spec(a):
        nd = a.ndim
        return pl.BlockSpec((None,) + tuple(a.shape[1:]),
                            lambda l, nd=nd: (l,) + (0,) * (nd - 1))

    kernel = functools.partial(_fused_forward_kernel, N=N, S=S, Tx=Tx, D=D, H=H)

    out = pl.pallas_call(
        kernel,
        grid=(L,),
        out_shape=jax.ShapeDtypeStruct((M, recon_pad), jnp.float32),
        in_specs=[const_spec(a) for a in const_args]
                 + [layer_spec(a) for a in layer_args],
        out_specs=pl.BlockSpec((M, recon_pad), lambda l: (0, 0)),
        scratch_shapes=[pltpu.VMEM((M, D), jnp.float32),   # resident activations
                        pltpu.VMEM((S, S), jnp.float32)],  # attention mask
        compiler_params=pltpu.CompilerParams(
            dimension_semantics=("arbitrary",),
            vmem_limit_bytes=32 * 1024 * 1024),
    )(*const_args, *layer_args)

    x_out = out[:, :recon].reshape(N, S, recon)                          # un-pad lanes
    forecast = jnp.transpose(x_out, (0, 2, 1))                           # [N, recon, S]
    return forecast[..., Tx - 1:-1]                                      # [N, recon, Tx]


if __name__ == "__main__":
    cfg = dict(
        input_long_size=4,
        hidden_dim=32,
        baseline_size=6,            # unused (use_statics=False)
        trans_layers=2,
        reconstruction_size=4,
        planned_treatments=False,   # unused in forward
        max_pos_encoding=100,
        d_pos_embed=8,
        nheads=4,
        ff_dim=64,
        output_dims=4,              # unused in forward
        t_embed=8,
    )
    key = jax.random.PRNGKey(0)
    kx, kt, kp = jax.random.split(key, 3)
    N, Tx = 2, 8
    X = jax.random.normal(kx, (N, cfg["input_long_size"], Tx), dtype=jnp.float32)
    T = jax.random.uniform(kt, (N, 1), dtype=jnp.float32)

    params = init_params(kp, cfg)
    fwd = jax.jit(functools.partial(transformer_model_forward, cfg=cfg))
    out = fwd(X, T, params)
    out = jax.block_until_ready(out)
    assert out.shape == (N, cfg["reconstruction_size"], Tx), out.shape
    assert bool(jnp.all(jnp.isfinite(out)))
    print("KERNEL_OK")
</pallas_src>

<mosaic_0001>
module attributes {stable_mosaic.version = 11 : i64} {
  func.func @_fused_forward_kernel(%arg0: i32, %arg1: memref<16x4xbf16, #tpu.memory_space<vmem>>, %arg2: memref<2x8xf32, #tpu.memory_space<vmem>>, %arg3: memref<16x8xf32, #tpu.memory_space<vmem>>, %arg4: memref<8x8xbf16, #tpu.memory_space<vmem>>, %arg5: memref<1x8xf32, #tpu.memory_space<vmem>>, %arg6: memref<8x32xbf16, #tpu.memory_space<vmem>>, %arg7: memref<4x32xbf16, #tpu.memory_space<vmem>>, %arg8: memref<8x32xbf16, #tpu.memory_space<vmem>>, %arg9: memref<1x32xf32, #tpu.memory_space<vmem>>, %arg10: memref<32x128xbf16, #tpu.memory_space<vmem>>, %arg11: memref<1x128xf32, #tpu.memory_space<vmem>>, %arg12: memref<1x32x96xbf16, #tpu.memory_space<vmem>>, %arg13: memref<1x1x96xf32, #tpu.memory_space<vmem>>, %arg14: memref<1x32x32xbf16, #tpu.memory_space<vmem>>, %arg15: memref<1x1x32xf32, #tpu.memory_space<vmem>>, %arg16: memref<1x1x32xf32, #tpu.memory_space<vmem>>, %arg17: memref<1x1x32xf32, #tpu.memory_space<vmem>>, %arg18: memref<1x32x64xbf16, #tpu.memory_space<vmem>>, %arg19: memref<1x1x64xf32, #tpu.memory_space<vmem>>, %arg20: memref<1x64x32xbf16, #tpu.memory_space<vmem>>, %arg21: memref<1x1x32xf32, #tpu.memory_space<vmem>>, %arg22: memref<1x1x32xf32, #tpu.memory_space<vmem>>, %arg23: memref<1x1x32xf32, #tpu.memory_space<vmem>>, %arg24: memref<32x128xf32, #tpu.memory_space<vmem>>, %arg25: memref<32x32xf32, #tpu.memory_space<vmem>>, %arg26: memref<16x16xf32, #tpu.memory_space<vmem>>) attributes {dimension_semantics = [#tpu.dimension_semantics<arbitrary>], iteration_bounds = array<i64: 2>, scalar_prefetch = 0 : i64, scratch_operands = 2 : i64, tpu.core_type = #tpu.core_type<tc>, window_params = [{pipeline_mode = #tpu.pipeline_mode<synchronous>, transform_indices = @transform_0, window_bounds = array<i64: 16, 4>}, {pipeline_mode = #tpu.pipeline_mode<synchronous>, transform_indices = @transform_1, window_bounds = array<i64: 2, 8>}, {pipeline_mode = #tpu.pipeline_mode<synchronous>, transform_indices = @transform_2, window_bounds = array<i64: 16, 8>}, {pipeline_mode = #tpu.pipeline_mode<synchronous>, transform_indices = @transform_3, window_bounds = array<i64: 8, 8>}, {pipeline_mode = #tpu.pipeline_mode<synchronous>, transform_indices = @transform_4, window_bounds = array<i64: 1, 8>}, {pipeline_mode = #tpu.pipeline_mode<synchronous>, transform_indices = @transform_5, window_bounds = array<i64: 8, 32>}, {pipeline_mode = #tpu.pipeline_mode<synchronous>, transform_indices = @transform_6, window_bounds = array<i64: 4, 32>}, {pipeline_mode = #tpu.pipeline_mode<synchronous>, transform_indices = @transform_7, window_bounds = array<i64: 8, 32>}, {pipeline_mode = #tpu.pipeline_mode<synchronous>, transform_indices = @transform_8, window_bounds = array<i64: 1, 32>}, {pipeline_mode = #tpu.pipeline_mode<synchronous>, transform_indices = @transform_9, window_bounds = array<i64: 32, 128>}, {pipeline_mode = #tpu.pipeline_mode<synchronous>, transform_indices = @transform_10, window_bounds = array<i64: 1, 128>}, {transform_indices = @transform_11, window_bounds = array<i64: 1, 32, 96>}, {transform_indices = @transform_12, window_bounds = array<i64: 1, 1, 96>}, {transform_indices = @transform_13, window_bounds = array<i64: 1, 32, 32>}, {transform_indices = @transform_14, window_bounds = array<i64: 1, 1, 32>}, {transform_indices = @transform_15, window_bounds = array<i64: 1, 1, 32>}, {transform_indices = @transform_16, window_bounds = array<i64: 1, 1, 32>}, {transform_indices = @transform_17, window_bounds = array<i64: 1, 32, 64>}, {transform_indices = @transform_18, window_bounds = array<i64: 1, 1, 64>}, {transform_indices = @transform_19, window_bounds = array<i64: 1, 64, 32>}, {transform_indices = @transform_20, window_bounds = array<i64: 1, 1, 32>}, {transform_indices = @transform_21, window_bounds = array<i64: 1, 1, 32>}, {transform_indices = @transform_22, window_bounds = array<i64: 1, 1, 32>}, {pipeline_mode = #tpu.pipeline_mode<synchronous>, transform_indices = @transform_23, window_bounds = array<i64: 32, 128>}]} {
    %c0_i32 = arith.constant 0 : i32
    %0 = arith.cmpi eq, %arg0, %c0_i32 : i32
    %1 = arith.extui %0 : i1 to i32
    %c0_i32_0 = arith.constant 0 : i32
    %2 = arith.cmpi ne, %1, %c0_i32_0 : i32
    scf.if %2 {
      %181 = tpu.iota {dimensions = array<i32: 0>} : vector<16x16xi32>
      %182 = tpu.iota {dimensions = array<i32: 1>} : vector<16x16xi32>
      %c8_i32 = arith.constant 8 : i32
      %183 = vector.broadcast %c8_i32 : i32 to vector<16x16xi32>
      %184 = arith.cmpi sge, %181, %183 : vector<16x16xi32>
      %c8_i32_73 = arith.constant 8 : i32
      %185 = vector.broadcast %c8_i32_73 : i32 to vector<16x16xi32>
      %186 = arith.cmpi slt, %182, %185 : vector<16x16xi32>
      %187 = arith.cmpi sle, %182, %181 : vector<16x16xi32>
      %188 = arith.andi %186, %187 : vector<16x16xi1>
      %189 = arith.ori %184, %188 : vector<16x16xi1>
      %cst_74 = arith.constant 0.000000e+00 : f32
      %cst_75 = arith.constant -1.000000e+09 : f32
      %190 = vector.broadcast %cst_74 : f32 to vector<16x16xf32>
      %191 = vector.broadcast %cst_75 : f32 to vector<16x16xf32>
      %192 = arith.select %189, %190, %191 : vector<16x16xi1>, vector<16x16xf32>
      %c0_76 = arith.constant 0 : index
      %c0_77 = arith.constant 0 : index
      %193 = vector.load %arg26[%c0_76, %c0_77] : memref<16x16xf32, #tpu.memory_space<vmem>>, vector<16x16xf32>
      tpu.vector_store %arg26[%c0_76, %c0_77], %192 {strides = array<i32>} : memref<16x16xf32, #tpu.memory_space<vmem>>, vector<16x16xf32>,
      %c0_78 = arith.constant 0 : index
      %c0_79 = arith.constant 0 : index
      %194 = vector.load %arg2[%c0_78, %c0_79] : memref<2x8xf32, #tpu.memory_space<vmem>>, vector<2x8xf32>
      %195 = arith.truncf %194 : vector<2x8xf32> to vector<2x8xbf16>
      %c0_80 = arith.constant 0 : index
      %c0_81 = arith.constant 0 : index
      %196 = vector.load %arg4[%c0_80, %c0_81] : memref<8x8xbf16, #tpu.memory_space<vmem>>, vector<8x8xbf16>
      %cst_82 = arith.constant dense<0.000000e+00> : vector<2x8xf32>
      %197 = tpu.matmul %195, %196, %cst_82 {dimension_numbers = #tpu.dot_dimension_numbers<[1], [0], [0], [1], [0, 0, 1, 1], [], []>} : vector<2x8xbf16>, vector<8x8xbf16>, vector<2x8xf32> -> vector<2x8xf32>
      %c0_83 = arith.constant 0 : index
      %c0_84 = arith.constant 0 : index
      %198 = vector.load %arg5[%c0_83, %c0_84] : memref<1x8xf32, #tpu.memory_space<vmem>>, vector<1x8xf32>
      %199 = vector.broadcast %198 : vector<1x8xf32> to vector<2x8xf32>
      %200 = arith.addf %197, %199 : vector<2x8xf32>
      %201 = arith.negf %200 : vector<2x8xf32>
      %202 = math.exp %201 : vector<2x8xf32>
      %cst_85 = arith.constant 1.000000e+00 : f32
      %203 = vector.broadcast %cst_85 : f32 to vector<2x8xf32>
      %204 = arith.addf %203, %202 : vector<2x8xf32>
      %205 = arith.divf %203, %204 : vector<2x8xf32>
      %206 = arith.mulf %200, %205 : vector<2x8xf32>
      %c0_86 = arith.constant 0 : index
      %c0_87 = arith.constant 0 : index
      %207 = vector.load %arg3[%c0_86, %c0_87] : memref<16x8xf32, #tpu.memory_space<vmem>>, vector<16x8xf32>
      %208 = arith.truncf %207 : vector<16x8xf32> to vector<16x8xbf16>
      %c0_88 = arith.constant 0 : index
      %c0_89 = arith.constant 0 : index
      %209 = vector.load %arg6[%c0_88, %c0_89] : memref<8x32xbf16, #tpu.memory_space<vmem>>, vector<8x32xbf16>
      %cst_90 = arith.constant dense<0.000000e+00> : vector<16x32xf32>
      %210 = tpu.matmul %208, %209, %cst_90 {dimension_numbers = #tpu.dot_dimension_numbers<[1], [0], [0], [1], [0, 0, 1, 1], [], []>} : vector<16x8xbf16>, vector<8x32xbf16>, vector<16x32xf32> -> vector<16x32xf32>
      %c0_91 = arith.constant 0 : index
      %c0_92 = arith.constant 0 : index
      %211 = vector.load %arg9[%c0_91, %c0_92] : memref<1x32xf32, #tpu.memory_space<vmem>>, vector<1x32xf32>
      %212 = vector.broadcast %211 : vector<1x32xf32> to vector<16x32xf32>
      %213 = arith.addf %210, %212 : vector<16x32xf32>
      %c0_93 = arith.constant 0 : index
      %c0_94 = arith.constant 0 : index
      %214 = vector.load %arg1[%c0_93, %c0_94] : memref<16x4xbf16, #tpu.memory_space<vmem>>, vector<16x4xbf16>
      %c0_95 = arith.constant 0 : index
      %c0_96 = arith.constant 0 : index
      %215 = vector.load %arg7[%c0_95, %c0_96] : memref<4x32xbf16, #tpu.memory_space<vmem>>, vector<4x32xbf16>
      %cst_97 = arith.constant dense<0.000000e+00> : vector<16x32xf32>
      %216 = tpu.matmul %214, %215, %cst_97 {dimension_numbers = #tpu.dot_dimension_numbers<[1], [0], [0], [1], [0, 0, 1, 1], [], []>} : vector<16x4xbf16>, vector<4x32xbf16>, vector<16x32xf32> -> vector<16x32xf32>
      %217 = arith.truncf %206 : vector<2x8xf32> to vector<2x8xbf16>
      %c0_98 = arith.constant 0 : index
      %c0_99 = arith.constant 0 : index
      %218 = vector.load %arg8[%c0_98, %c0_99] : memref<8x32xbf16, #tpu.memory_space<vmem>>, vector<8x32xbf16>
      %cst_100 = arith.constant dense<0.000000e+00> : vector<2x32xf32>
      %219 = tpu.matmul %217, %218, %cst_100 {dimension_numbers = #tpu.dot_dimension_numbers<[1], [0], [0], [1], [0, 0, 1, 1], [], []>} : vector<2x8xbf16>, vector<8x32xbf16>, vector<2x32xf32> -> vector<2x32xf32>
      %220 = vector.extract_strided_slice %216 {offsets = [0, 0], sizes = [8, 32], strides = [1, 1]} : vector<16x32xf32> to vector<8x32xf32>
      %221 = vector.extract_strided_slice %219 {offsets = [0, 0], sizes = [1, 32], strides = [1, 1]} : vector<2x32xf32> to vector<1x32xf32>
      %222 = vector.broadcast %221 : vector<1x32xf32> to vector<8x32xf32>
      %223 = arith.addf %220, %222 : vector<8x32xf32>
      %224 = vector.extract_strided_slice %213 {offsets = [0, 0], sizes = [8, 32], strides = [1, 1]} : vector<16x32xf32> to vector<8x32xf32>
      %225 = arith.addf %223, %224 : vector<8x32xf32>
      %c0_101 = arith.constant 0 : index
      %c0_102 = arith.constant 0 : index
      %226 = vector.load %arg25[%c0_101, %c0_102] : memref<32x32xf32, #tpu.memory_space<vmem>>, vector<8x32xf32>
      tpu.vector_store %arg25[%c0_101, %c0_102], %225 {strides = array<i32>} : memref<32x32xf32, #tpu.memory_space<vmem>>, vector<8x32xf32>,
      %227 = vector.extract_strided_slice %213 {offsets = [8, 0], sizes = [8, 32], strides = [1, 1]} : vector<16x32xf32> to vector<8x32xf32>
      %c8 = arith.constant 8 : index
      %c0_103 = arith.constant 0 : index
      %228 = vector.load %arg25[%c8, %c0_103] : memref<32x32xf32, #tpu.memory_space<vmem>>, vector<8x32xf32>
      tpu.vector_store %arg25[%c8, %c0_103], %227 {strides = array<i32>} : memref<32x32xf32, #tpu.memory_space<vmem>>, vector<8x32xf32>,
      %229 = vector.extract_strided_slice %216 {offsets = [8, 0], sizes = [8, 32], strides = [1, 1]} : vector<16x32xf32> to vector<8x32xf32>
      %230 = vector.extract_strided_slice %219 {offsets = [1, 0], sizes = [1, 32], strides = [1, 1]} : vector<2x32xf32> to vector<1x32xf32>
      %231 = vector.broadcast %230 : vector<1x32xf32> to vector<8x32xf32>
      %232 = arith.addf %229, %231 : vector<8x32xf32>
      %233 = vector.extract_strided_slice %213 {offsets = [0, 0], sizes = [8, 32], strides = [1, 1]} : vector<16x32xf32> to vector<8x32xf32>
      %234 = arith.addf %232, %233 : vector<8x32xf32>
      %c16 = arith.constant 16 : index
      %c0_104 = arith.constant 0 : index
      %235 = vector.load %arg25[%c16, %c0_104] : memref<32x32xf32, #tpu.memory_space<vmem>>, vector<8x32xf32>
      tpu.vector_store %arg25[%c16, %c0_104], %234 {strides = array<i32>} : memref<32x32xf32, #tpu.memory_space<vmem>>, vector<8x32xf32>,
      %236 = vector.extract_strided_slice %213 {offsets = [8, 0], sizes = [8, 32], strides = [1, 1]} : vector<16x32xf32> to vector<8x32xf32>
      %c24 = arith.constant 24 : index
      %c0_105 = arith.constant 0 : index
      %237 = vector.load %arg25[%c24, %c0_105] : memref<32x32xf32, #tpu.memory_space<vmem>>, vector<8x32xf32>
      tpu.vector_store %arg25[%c24, %c0_105], %236 {strides = array<i32>} : memref<32x32xf32, #tpu.memory_space<vmem>>, vector<8x32xf32>,
    } else {
    }
    %c0 = arith.constant 0 : index
    %c0_1 = arith.constant 0 : index
    %3 = vector.load %arg25[%c0, %c0_1] : memref<32x32xf32, #tpu.memory_space<vmem>>, vector<32x32xf32>
    %4 = arith.truncf %3 : vector<32x32xf32> to vector<32x32xbf16>
    %c0_2 = arith.constant 0 : index
    %c0_3 = arith.constant 0 : index
    %c0_4 = arith.constant 0 : index
    %5 = vector.load %arg12[%c0_2, %c0_3, %c0_4] : memref<1x32x96xbf16, #tpu.memory_space<vmem>>, vector<1x32x96xbf16>
    %6 = vector.shape_cast %5 : vector<1x32x96xbf16> to vector<32x96xbf16>
    %cst = arith.constant dense<0.000000e+00> : vector<32x96xf32>
    %7 = tpu.matmul %4, %6, %cst {dimension_numbers = #tpu.dot_dimension_numbers<[1], [0], [0], [1], [0, 0, 1, 1], [], []>} : vector<32x32xbf16>, vector<32x96xbf16>, vector<32x96xf32> -> vector<32x96xf32>
    %c0_5 = arith.constant 0 : index
    %c0_6 = arith.constant 0 : index
    %c0_7 = arith.constant 0 : index
    %8 = vector.load %arg13[%c0_5, %c0_6, %c0_7] : memref<1x1x96xf32, #tpu.memory_space<vmem>>, vector<1x1x96xf32>
    %9 = vector.shape_cast %8 : vector<1x1x96xf32> to vector<1x96xf32>
    %10 = vector.broadcast %9 : vector<1x96xf32> to vector<32x96xf32>
    %11 = arith.addf %7, %10 : vector<32x96xf32>
    %12 = arith.truncf %11 : vector<32x96xf32> to vector<32x96xbf16>
    %c0_8 = arith.constant 0 : index
    %c0_9 = arith.constant 0 : index
    %13 = vector.load %arg26[%c0_8, %c0_9] : memref<16x16xf32, #tpu.memory_space<vmem>>, vector<16x16xf32>
    %14 = vector.shape_cast %13 : vector<16x16xf32> to vector<1x16x16xf32>
    %15 = vector.broadcast %14 : vector<1x16x16xf32> to vector<2x16x16xf32>
    %16 = vector.extract_strided_slice %12 {offsets = [0, 0], sizes = [32, 8], strides = [1, 1]} : vector<32x96xbf16> to vector<32x8xbf16>
    %17 = vector.shape_cast %16 : vector<32x8xbf16> to vector<2x16x8xbf16>
    %18 = vector.extract_strided_slice %12 {offsets = [0, 32], sizes = [32, 8], strides = [1, 1]} : vector<32x96xbf16> to vector<32x8xbf16>
    %19 = vector.shape_cast %18 : vector<32x8xbf16> to vector<2x16x8xbf16>
    %20 = vector.extract_strided_slice %12 {offsets = [0, 64], sizes = [32, 8], strides = [1, 1]} : vector<32x96xbf16> to vector<32x8xbf16>
    %21 = vector.shape_cast %20 : vector<32x8xbf16> to vector<2x16x8xbf16>
    "tpu.trace_start"() <{level = 10 : i32, message = "bqd,bkd->bqk"}> : () -> ()
    %cst_10 = arith.constant dense<0.000000e+00> : vector<2x16x16xf32>
    %22 = tpu.matmul %17, %19, %cst_10 {dimension_numbers = #tpu.dot_dimension_numbers<[2], [2], [1], [1], [0, 0, 0, 1, 1, 1], [0], [0]>} : vector<2x16x8xbf16>, vector<2x16x8xbf16>, vector<2x16x16xf32> -> vector<2x16x16xf32>
    "tpu.trace_stop"() : () -> ()
    %23 = arith.addf %22, %15 : vector<2x16x16xf32>
    %cst_11 = arith.constant dense<0xFF800000> : vector<2x16xf32>
    %24 = vector.multi_reduction <maximumf>, %23, %cst_11 [2] : vector<2x16x16xf32> to vector<2x16xf32>
    %25 = vector.shape_cast %24 : vector<2x16xf32> to vector<2x16x1xf32>
    %26 = vector.broadcast %25 : vector<2x16x1xf32> to vector<2x16x16xf32>
    %27 = arith.subf %23, %26 : vector<2x16x16xf32>
    %28 = math.exp %27 : vector<2x16x16xf32>
    %cst_12 = arith.constant dense<0.000000e+00> : vector<2x16xf32>
    %29 = vector.multi_reduction <add>, %28, %cst_12 [2] : vector<2x16x16xf32> to vector<2x16xf32>
    %30 = vector.shape_cast %29 : vector<2x16xf32> to vector<2x16x1xf32>
    %31 = tpu.reciprocal %30 {approx = true} : vector<2x16x1xf32> -> vector<2x16x1xf32>
    %32 = vector.broadcast %31 : vector<2x16x1xf32> to vector<2x16x16xf32>
    %33 = arith.mulf %28, %32 : vector<2x16x16xf32>
    %34 = arith.truncf %33 : vector<2x16x16xf32> to vector<2x16x16xbf16>
    "tpu.trace_start"() <{level = 10 : i32, message = "bqk,bkd->bqd"}> : () -> ()
    %cst_13 = arith.constant dense<0.000000e+00> : vector<2x16x8xf32>
    %35 = tpu.matmul %34, %21, %cst_13 {dimension_numbers = #tpu.dot_dimension_numbers<[2], [1], [1], [2], [0, 0, 0, 1, 1, 2], [0], [0]>} : vector<2x16x16xbf16>, vector<2x16x8xbf16>, vector<2x16x8xf32> -> vector<2x16x8xf32>
    "tpu.trace_stop"() : () -> ()
    %36 = vector.shape_cast %35 : vector<2x16x8xf32> to vector<32x8xf32>
    %37 = vector.extract_strided_slice %12 {offsets = [0, 8], sizes = [32, 8], strides = [1, 1]} : vector<32x96xbf16> to vector<32x8xbf16>
    %38 = vector.shape_cast %37 : vector<32x8xbf16> to vector<2x16x8xbf16>
    %39 = vector.extract_strided_slice %12 {offsets = [0, 40], sizes = [32, 8], strides = [1, 1]} : vector<32x96xbf16> to vector<32x8xbf16>
    %40 = vector.shape_cast %39 : vector<32x8xbf16> to vector<2x16x8xbf16>
    %41 = vector.extract_strided_slice %12 {offsets = [0, 72], sizes = [32, 8], strides = [1, 1]} : vector<32x96xbf16> to vector<32x8xbf16>
    %42 = vector.shape_cast %41 : vector<32x8xbf16> to vector<2x16x8xbf16>
    "tpu.trace_start"() <{level = 10 : i32, message = "bqd,bkd->bqk"}> : () -> ()
    %cst_14 = arith.constant dense<0.000000e+00> : vector<2x16x16xf32>
    %43 = tpu.matmul %38, %40, %cst_14 {dimension_numbers = #tpu.dot_dimension_numbers<[2], [2], [1], [1], [0, 0, 0, 1, 1, 1], [0], [0]>} : vector<2x16x8xbf16>, vector<2x16x8xbf16>, vector<2x16x16xf32> -> vector<2x16x16xf32>
    "tpu.trace_stop"() : () -> ()
    %44 = arith.addf %43, %15 : vector<2x16x16xf32>
    %cst_15 = arith.constant dense<0xFF800000> : vector<2x16xf32>
    %45 = vector.multi_reduction <maximumf>, %44, %cst_15 [2] : vector<2x16x16xf32> to vector<2x16xf32>
    %46 = vector.shape_cast %45 : vector<2x16xf32> to vector<2x16x1xf32>
    %47 = vector.broadcast %46 : vector<2x16x1xf32> to vector<2x16x16xf32>
    %48 = arith.subf %44, %47 : vector<2x16x16xf32>
    %49 = math.exp %48 : vector<2x16x16xf32>
    %cst_16 = arith.constant dense<0.000000e+00> : vector<2x16xf32>
    %50 = vector.multi_reduction <add>, %49, %cst_16 [2] : vector<2x16x16xf32> to vector<2x16xf32>
    %51 = vector.shape_cast %50 : vector<2x16xf32> to vector<2x16x1xf32>
    %52 = tpu.reciprocal %51 {approx = true} : vector<2x16x1xf32> -> vector<2x16x1xf32>
    %53 = vector.broadcast %52 : vector<2x16x1xf32> to vector<2x16x16xf32>
    %54 = arith.mulf %49, %53 : vector<2x16x16xf32>
    %55 = arith.truncf %54 : vector<2x16x16xf32> to vector<2x16x16xbf16>
    "tpu.trace_start"() <{level = 10 : i32, message = "bqk,bkd->bqd"}> : () -> ()
    %cst_17 = arith.constant dense<0.000000e+00> : vector<2x16x8xf32>
    %56 = tpu.matmul %55, %42, %cst_17 {dimension_numbers = #tpu.dot_dimension_numbers<[2], [1], [1], [2], [0, 0, 0, 1, 1, 2], [0], [0]>} : vector<2x16x16xbf16>, vector<2x16x8xbf16>, vector<2x16x8xf32> -> vector<2x16x8xf32>
    "tpu.trace_stop"() : () -> ()
    %57 = vector.shape_cast %56 : vector<2x16x8xf32> to vector<32x8xf32>
    %58 = vector.extract_strided_slice %12 {offsets = [0, 16], sizes = [32, 8], strides = [1, 1]} : vector<32x96xbf16> to vector<32x8xbf16>
    %59 = vector.shape_cast %58 : vector<32x8xbf16> to vector<2x16x8xbf16>
    %60 = vector.extract_strided_slice %12 {offsets = [0, 48], sizes = [32, 8], strides = [1, 1]} : vector<32x96xbf16> to vector<32x8xbf16>
    %61 = vector.shape_cast %60 : vector<32x8xbf16> to vector<2x16x8xbf16>
    %62 = vector.extract_strided_slice %12 {offsets = [0, 80], sizes = [32, 8], strides = [1, 1]} : vector<32x96xbf16> to vector<32x8xbf16>
    %63 = vector.shape_cast %62 : vector<32x8xbf16> to vector<2x16x8xbf16>
    "tpu.trace_start"() <{level = 10 : i32, message = "bqd,bkd->bqk"}> : () -> ()
    %cst_18 = arith.constant dense<0.000000e+00> : vector<2x16x16xf32>
    %64 = tpu.matmul %59, %61, %cst_18 {dimension_numbers = #tpu.dot_dimension_numbers<[2], [2], [1], [1], [0, 0, 0, 1, 1, 1], [0], [0]>} : vector<2x16x8xbf16>, vector<2x16x8xbf16>, vector<2x16x16xf32> -> vector<2x16x16xf32>
    "tpu.trace_stop"() : () -> ()
    %65 = arith.addf %64, %15 : vector<2x16x16xf32>
    %cst_19 = arith.constant dense<0xFF800000> : vector<2x16xf32>
    %66 = vector.multi_reduction <maximumf>, %65, %cst_19 [2] : vector<2x16x16xf32> to vector<2x16xf32>
    %67 = vector.shape_cast %66 : vector<2x16xf32> to vector<2x16x1xf32>
    %68 = vector.broadcast %67 : vector<2x16x1xf32> to vector<2x16x16xf32>
    %69 = arith.subf %65, %68 : vector<2x16x16xf32>
    %70 = math.exp %69 : vector<2x16x16xf32>
    %cst_20 = arith.constant dense<0.000000e+00> : vector<2x16xf32>
    %71 = vector.multi_reduction <add>, %70, %cst_20 [2] : vector<2x16x16xf32> to vector<2x16xf32>
    %72 = vector.shape_cast %71 : vector<2x16xf32> to vector<2x16x1xf32>
    %73 = tpu.reciprocal %72 {approx = true} : vector<2x16x1xf32> -> vector<2x16x1xf32>
    %74 = vector.broadcast %73 : vector<2x16x1xf32> to vector<2x16x16xf32>
    %75 = arith.mulf %70, %74 : vector<2x16x16xf32>
    %76 = arith.truncf %75 : vector<2x16x16xf32> to vector<2x16x16xbf16>
    "tpu.trace_start"() <{level = 10 : i32, message = "bqk,bkd->bqd"}> : () -> ()
    %cst_21 = arith.constant dense<0.000000e+00> : vector<2x16x8xf32>
    %77 = tpu.matmul %76, %63, %cst_21 {dimension_numbers = #tpu.dot_dimension_numbers<[2], [1], [1], [2], [0, 0, 0, 1, 1, 2], [0], [0]>} : vector<2x16x16xbf16>, vector<2x16x8xbf16>, vector<2x16x8xf32> -> vector<2x16x8xf32>
    "tpu.trace_stop"() : () -> ()
    %78 = vector.shape_cast %77 : vector<2x16x8xf32> to vector<32x8xf32>
    %79 = vector.extract_strided_slice %12 {offsets = [0, 24], sizes = [32, 8], strides = [1, 1]} : vector<32x96xbf16> to vector<32x8xbf16>
    %80 = vector.shape_cast %79 : vector<32x8xbf16> to vector<2x16x8xbf16>
    %81 = vector.extract_strided_slice %12 {offsets = [0, 56], sizes = [32, 8], strides = [1, 1]} : vector<32x96xbf16> to vector<32x8xbf16>
    %82 = vector.shape_cast %81 : vector<32x8xbf16> to vector<2x16x8xbf16>
    %83 = vector.extract_strided_slice %12 {offsets = [0, 88], sizes = [32, 8], strides = [1, 1]} : vector<32x96xbf16> to vector<32x8xbf16>
    %84 = vector.shape_cast %83 : vector<32x8xbf16> to vector<2x16x8xbf16>
    "tpu.trace_start"() <{level = 10 : i32, message = "bqd,bkd->bqk"}> : () -> ()
    %cst_22 = arith.constant dense<0.000000e+00> : vector<2x16x16xf32>
    %85 = tpu.matmul %80, %82, %cst_22 {dimension_numbers = #tpu.dot_dimension_numbers<[2], [2], [1], [1], [0, 0, 0, 1, 1, 1], [0], [0]>} : vector<2x16x8xbf16>, vector<2x16x8xbf16>, vector<2x16x16xf32> -> vector<2x16x16xf32>
    "tpu.trace_stop"() : () -> ()
    %86 = arith.addf %85, %15 : vector<2x16x16xf32>
    %cst_23 = arith.constant dense<0xFF800000> : vector<2x16xf32>
    %87 = vector.multi_reduction <maximumf>, %86, %cst_23 [2] : vector<2x16x16xf32> to vector<2x16xf32>
    %88 = vector.shape_cast %87 : vector<2x16xf32> to vector<2x16x1xf32>
    %89 = vector.broadcast %88 : vector<2x16x1xf32> to vector<2x16x16xf32>
    %90 = arith.subf %86, %89 : vector<2x16x16xf32>
    %91 = math.exp %90 : vector<2x16x16xf32>
    %cst_24 = arith.constant dense<0.000000e+00> : vector<2x16xf32>
    %92 = vector.multi_reduction <add>, %91, %cst_24 [2] : vector<2x16x16xf32> to vector<2x16xf32>
    %93 = vector.shape_cast %92 : vector<2x16xf32> to vector<2x16x1xf32>
    %94 = tpu.reciprocal %93 {approx = true} : vector<2x16x1xf32> -> vector<2x16x1xf32>
    %95 = vector.broadcast %94 : vector<2x16x1xf32> to vector<2x16x16xf32>
    %96 = arith.mulf %91, %95 : vector<2x16x16xf32>
    %97 = arith.truncf %96 : vector<2x16x16xf32> to vector<2x16x16xbf16>
    "tpu.trace_start"() <{level = 10 : i32, message = "bqk,bkd->bqd"}> : () -> ()
    %cst_25 = arith.constant dense<0.000000e+00> : vector<2x16x8xf32>
    %98 = tpu.matmul %97, %84, %cst_25 {dimension_numbers = #tpu.dot_dimension_numbers<[2], [1], [1], [2], [0, 0, 0, 1, 1, 2], [0], [0]>} : vector<2x16x16xbf16>, vector<2x16x8xbf16>, vector<2x16x8xf32> -> vector<2x16x8xf32>
    "tpu.trace_stop"() : () -> ()
    %99 = vector.shape_cast %98 : vector<2x16x8xf32> to vector<32x8xf32>
    %100 = tpu.concatenate %36, %57, %78, %99 in 1 : vector<32x8xf32>, vector<32x8xf32>, vector<32x8xf32>, vector<32x8xf32> -> vector<32x32xf32>
    %101 = arith.truncf %100 : vector<32x32xf32> to vector<32x32xbf16>
    %c0_26 = arith.constant 0 : index
    %c0_27 = arith.constant 0 : index
    %c0_28 = arith.constant 0 : index
    %102 = vector.load %arg14[%c0_26, %c0_27, %c0_28] : memref<1x32x32xbf16, #tpu.memory_space<vmem>>, vector<1x32x32xbf16>
    %103 = vector.shape_cast %102 : vector<1x32x32xbf16> to vector<32x32xbf16>
    %cst_29 = arith.constant dense<0.000000e+00> : vector<32x32xf32>
    %104 = tpu.matmul %101, %103, %cst_29 {dimension_numbers = #tpu.dot_dimension_numbers<[1], [0], [0], [1], [0, 0, 1, 1], [], []>} : vector<32x32xbf16>, vector<32x32xbf16>, vector<32x32xf32> -> vector<32x32xf32>
    %c0_30 = arith.constant 0 : index
    %c0_31 = arith.constant 0 : index
    %c0_32 = arith.constant 0 : index
    %105 = vector.load %arg15[%c0_30, %c0_31, %c0_32] : memref<1x1x32xf32, #tpu.memory_space<vmem>>, vector<1x1x32xf32>
    %106 = vector.shape_cast %105 : vector<1x1x32xf32> to vector<1x32xf32>
    %107 = vector.broadcast %106 : vector<1x32xf32> to vector<32x32xf32>
    %108 = arith.addf %104, %107 : vector<32x32xf32>
    %109 = arith.addf %3, %108 : vector<32x32xf32>
    %cst_33 = arith.constant dense<0.000000e+00> : vector<32xf32>
    %110 = vector.multi_reduction <add>, %109, %cst_33 [1] : vector<32x32xf32> to vector<32xf32>
    %111 = vector.shape_cast %110 : vector<32xf32> to vector<32x1xf32>
    %cst_34 = arith.constant 3.200000e+01 : f32
    %112 = vector.broadcast %cst_34 : f32 to vector<32x1xf32>
    %113 = arith.divf %111, %112 : vector<32x1xf32>
    %114 = vector.broadcast %113 : vector<32x1xf32> to vector<32x32xf32>
    %115 = arith.subf %109, %114 : vector<32x32xf32>
    %116 = arith.mulf %115, %115 : vector<32x32xf32>
    %cst_35 = arith.constant dense<0.000000e+00> : vector<32xf32>
    %117 = vector.multi_reduction <add>, %116, %cst_35 [1] : vector<32x32xf32> to vector<32xf32>
    %118 = vector.shape_cast %117 : vector<32xf32> to vector<32x1xf32>
    %cst_36 = arith.constant 3.200000e+01 : f32
    %119 = vector.broadcast %cst_36 : f32 to vector<32x1xf32>
    %120 = arith.divf %118, %119 : vector<32x1xf32>
    %cst_37 = arith.constant 9.99999974E-6 : f32
    %121 = vector.broadcast %cst_37 : f32 to vector<32x1xf32>
    %122 = arith.addf %120, %121 : vector<32x1xf32>
    %123 = math.rsqrt %122 : vector<32x1xf32>
    %124 = vector.broadcast %123 : vector<32x1xf32> to vector<32x32xf32>
    %125 = arith.mulf %115, %124 : vector<32x32xf32>
    %c0_38 = arith.constant 0 : index
    %c0_39 = arith.constant 0 : index
    %c0_40 = arith.constant 0 : index
    %126 = vector.load %arg16[%c0_38, %c0_39, %c0_40] : memref<1x1x32xf32, #tpu.memory_space<vmem>>, vector<1x1x32xf32>
    %127 = vector.shape_cast %126 : vector<1x1x32xf32> to vector<1x32xf32>
    %128 = vector.broadcast %127 : vector<1x32xf32> to vector<32x32xf32>
    %129 = arith.mulf %125, %128 : vector<32x32xf32>
    %c0_41 = arith.constant 0 : index
    %c0_42 = arith.constant 0 : index
    %c0_43 = arith.constant 0 : index
    %130 = vector.load %arg17[%c0_41, %c0_42, %c0_43] : memref<1x1x32xf32, #tpu.memory_space<vmem>>, vector<1x1x32xf32>
    %131 = vector.shape_cast %130 : vector<1x1x32xf32> to vector<1x32xf32>
    %132 = vector.broadcast %131 : vector<1x32xf32> to vector<32x32xf32>
    %133 = arith.addf %129, %132 : vector<32x32xf32>
    %134 = arith.truncf %133 : vector<32x32xf32> to vector<32x32xbf16>
    %c0_44 = arith.constant 0 : index
    %c0_45 = arith.constant 0 : index
    %c0_46 = arith.constant 0 : index
    %135 = vector.load %arg18[%c0_44, %c0_45, %c0_46] : memref<1x32x64xbf16, #tpu.memory_space<vmem>>, vector<1x32x64xbf16>
    %136 = vector.shape_cast %135 : vector<1x32x64xbf16> to vector<32x64xbf16>
    %cst_47 = arith.constant dense<0.000000e+00> : vector<32x64xf32>
    %137 = tpu.matmul %134, %136, %cst_47 {dimension_numbers = #tpu.dot_dimension_numbers<[1], [0], [0], [1], [0, 0, 1, 1], [], []>} : vector<32x32xbf16>, vector<32x64xbf16>, vector<32x64xf32> -> vector<32x64xf32>
    %c0_48 = arith.constant 0 : index
    %c0_49 = arith.constant 0 : index
    %c0_50 = arith.constant 0 : index
    %138 = vector.load %arg19[%c0_48, %c0_49, %c0_50] : memref<1x1x64xf32, #tpu.memory_space<vmem>>, vector<1x1x64xf32>
    %139 = vector.shape_cast %138 : vector<1x1x64xf32> to vector<1x64xf32>
    %140 = vector.broadcast %139 : vector<1x64xf32> to vector<32x64xf32>
    %141 = arith.addf %137, %140 : vector<32x64xf32>
    %cst_51 = arith.constant 0.000000e+00 : f32
    %142 = vector.broadcast %cst_51 : f32 to vector<32x64xf32>
    %143 = arith.maximumf %141, %142 : vector<32x64xf32>
    %144 = arith.truncf %143 : vector<32x64xf32> to vector<32x64xbf16>
    %c0_52 = arith.constant 0 : index
    %c0_53 = arith.constant 0 : index
    %c0_54 = arith.constant 0 : index
    %145 = vector.load %arg20[%c0_52, %c0_53, %c0_54] : memref<1x64x32xbf16, #tpu.memory_space<vmem>>, vector<1x64x32xbf16>
    %146 = vector.shape_cast %145 : vector<1x64x32xbf16> to vector<64x32xbf16>
    %cst_55 = arith.constant dense<0.000000e+00> : vector<32x32xf32>
    %147 = tpu.matmul %144, %146, %cst_55 {dimension_numbers = #tpu.dot_dimension_numbers<[1], [0], [0], [1], [0, 0, 1, 1], [], []>} : vector<32x64xbf16>, vector<64x32xbf16>, vector<32x32xf32> -> vector<32x32xf32>
    %c0_56 = arith.constant 0 : index
    %c0_57 = arith.constant 0 : index
    %c0_58 = arith.constant 0 : index
    %148 = vector.load %arg21[%c0_56, %c0_57, %c0_58] : memref<1x1x32xf32, #tpu.memory_space<vmem>>, vector<1x1x32xf32>
    %149 = vector.shape_cast %148 : vector<1x1x32xf32> to vector<1x32xf32>
    %150 = vector.broadcast %149 : vector<1x32xf32> to vector<32x32xf32>
    %151 = arith.addf %147, %150 : vector<32x32xf32>
    %152 = arith.addf %133, %151 : vector<32x32xf32>
    %cst_59 = arith.constant dense<0.000000e+00> : vector<32xf32>
    %153 = vector.multi_reduction <add>, %152, %cst_59 [1] : vector<32x32xf32> to vector<32xf32>
    %154 = vector.shape_cast %153 : vector<32xf32> to vector<32x1xf32>
    %cst_60 = arith.constant 3.200000e+01 : f32
    %155 = vector.broadcast %cst_60 : f32 to vector<32x1xf32>
    %156 = arith.divf %154, %155 : vector<32x1xf32>
    %157 = vector.broadcast %156 : vector<32x1xf32> to vector<32x32xf32>
    %158 = arith.subf %152, %157 : vector<32x32xf32>
    %159 = arith.mulf %158, %158 : vector<32x32xf32>
    %cst_61 = arith.constant dense<0.000000e+00> : vector<32xf32>
    %160 = vector.multi_reduction <add>, %159, %cst_61 [1] : vector<32x32xf32> to vector<32xf32>
    %161 = vector.shape_cast %160 : vector<32xf32> to vector<32x1xf32>
    %cst_62 = arith.constant 3.200000e+01 : f32
    %162 = vector.broadcast %cst_62 : f32 to vector<32x1xf32>
    %163 = arith.divf %161, %162 : vector<32x1xf32>
    %cst_63 = arith.constant 9.99999974E-6 : f32
    %164 = vector.broadcast %cst_63 : f32 to vector<32x1xf32>
    %165 = arith.addf %163, %164 : vector<32x1xf32>
    %166 = math.rsqrt %165 : vector<32x1xf32>
    %167 = vector.broadcast %166 : vector<32x1xf32> to vector<32x32xf32>
    %168 = arith.mulf %158, %167 : vector<32x32xf32>
    %c0_64 = arith.constant 0 : index
    %c0_65 = arith.constant 0 : index
    %c0_66 = arith.constant 0 : index
    %169 = vector.load %arg22[%c0_64, %c0_65, %c0_66] : memref<1x1x32xf32, #tpu.memory_space<vmem>>, vector<1x1x32xf32>
    %170 = vector.shape_cast %169 : vector<1x1x32xf32> to vector<1x32xf32>
    %171 = vector.broadcast %170 : vector<1x32xf32> to vector<32x32xf32>
    %172 = arith.mulf %168, %171 : vector<32x32xf32>
    %c0_67 = arith.constant 0 : index
    %c0_68 = arith.constant 0 : index
    %c0_69 = arith.constant 0 : index
    %173 = vector.load %arg23[%c0_67, %c0_68, %c0_69] : memref<1x1x32xf32, #tpu.memory_space<vmem>>, vector<1x1x32xf32>
    %174 = vector.shape_cast %173 : vector<1x1x32xf32> to vector<1x32xf32>
    %175 = vector.broadcast %174 : vector<1x32xf32> to vector<32x32xf32>
    %176 = arith.addf %172, %175 : vector<32x32xf32>
    %c0_70 = arith.constant 0 : index
    %c0_71 = arith.constant 0 : index
    %177 = vector.load %arg25[%c0_70, %c0_71] : memref<32x32xf32, #tpu.memory_space<vmem>>, vector<32x32xf32>
    tpu.vector_store %arg25[%c0_70, %c0_71], %176 {strides = array<i32>} : memref<32x32xf32, #tpu.memory_space<vmem>>, vector<32x32xf32>,
    %c1_i32 = arith.constant 1 : i32
    %178 = arith.cmpi eq, %arg0, %c1_i32 : i32
    %179 = arith.extui %178 : i1 to i32
    %c0_i32_72 = arith.constant 0 : i32
    %180 = arith.cmpi ne, %179, %c0_i32_72 : i32
    scf.if %180 {
      %181 = arith.truncf %176 : vector<32x32xf32> to vector<32x32xbf16>
      %c0_73 = arith.constant 0 : index
      %c0_74 = arith.constant 0 : index
      %182 = vector.load %arg10[%c0_73, %c0_74] : memref<32x128xbf16, #tpu.memory_space<vmem>>, vector<32x128xbf16>
      %cst_75 = arith.constant dense<0.000000e+00> : vector<32x128xf32>
      %183 = tpu.matmul %181, %182, %cst_75 {dimension_numbers = #tpu.dot_dimension_numbers<[1], [0], [0], [1], [0, 0, 1, 1], [], []>} : vector<32x32xbf16>, vector<32x128xbf16>, vector<32x128xf32> -> vector<32x128xf32>
      %c0_76 = arith.constant 0 : index
      %c0_77 = arith.constant 0 : index
      %184 = vector.load %arg11[%c0_76, %c0_77] : memref<1x128xf32, #tpu.memory_space<vmem>>, vector<1x128xf32>
      %185 = vector.broadcast %184 : vector<1x128xf32> to vector<32x128xf32>
      %186 = arith.addf %183, %185 : vector<32x128xf32>
      %c0_78 = arith.constant 0 : index
      %c0_79 = arith.constant 0 : index
      %187 = vector.load %arg24[%c0_78, %c0_79] : memref<32x128xf32, #tpu.memory_space<vmem>>, vector<32x128xf32>
      tpu.vector_store %arg24[%c0_78, %c0_79], %186 {strides = array<i32>} : memref<32x128xf32, #tpu.memory_space<vmem>>, vector<32x128xf32>,
    } else {
    }
    return
  }
  func.func @transform_0(%arg0: i32) -> (i32, i32) {
    %c0_i32 = arith.constant 0 : i32
    %c0_i32_0 = arith.constant 0 : i32
    %c0_i32_1 = arith.constant 0 : i32
    return %c0_i32, %c0_i32_0 : i32, i32
  }
  func.func @transform_1(%arg0: i32) -> (i32, i32) {
    %c0_i32 = arith.constant 0 : i32
    %c0_i32_0 = arith.constant 0 : i32
    %c0_i32_1 = arith.constant 0 : i32
    return %c0_i32, %c0_i32_0 : i32, i32
  }
  func.func @transform_2(%arg0: i32) -> (i32, i32) {
    %c0_i32 = arith.constant 0 : i32
    %c0_i32_0 = arith.constant 0 : i32
    %c0_i32_1 = arith.constant 0 : i32
    return %c0_i32, %c0_i32_0 : i32, i32
  }
  func.func @transform_3(%arg0: i32) -> (i32, i32) {
    %c0_i32 = arith.constant 0 : i32
    %c0_i32_0 = arith.constant 0 : i32
    %c0_i32_1 = arith.constant 0 : i32
    return %c0_i32, %c0_i32_0 : i32, i32
  }
  func.func @transform_4(%arg0: i32) -> (i32, i32) {
    %c0_i32 = arith.constant 0 : i32
    %c0_i32_0 = arith.constant 0 : i32
    %c0_i32_1 = arith.constant 0 : i32
    return %c0_i32, %c0_i32_0 : i32, i32
  }
  func.func @transform_5(%arg0: i32) -> (i32, i32) {
    %c0_i32 = arith.constant 0 : i32
    %c0_i32_0 = arith.constant 0 : i32
    %c0_i32_1 = arith.constant 0 : i32
    return %c0_i32, %c0_i32_0 : i32, i32
  }
  func.func @transform_6(%arg0: i32) -> (i32, i32) {
    %c0_i32 = arith.constant 0 : i32
    %c0_i32_0 = arith.constant 0 : i32
    %c0_i32_1 = arith.constant 0 : i32
    return %c0_i32, %c0_i32_0 : i32, i32
  }
  func.func @transform_7(%arg0: i32) -> (i32, i32) {
    %c0_i32 = arith.constant 0 : i32
    %c0_i32_0 = arith.constant 0 : i32
    %c0_i32_1 = arith.constant 0 : i32
    return %c0_i32, %c0_i32_0 : i32, i32
  }
  func.func @transform_8(%arg0: i32) -> (i32, i32) {
    %c0_i32 = arith.constant 0 : i32
    %c0_i32_0 = arith.constant 0 : i32
    %c0_i32_1 = arith.constant 0 : i32
    return %c0_i32, %c0_i32_0 : i32, i32
  }
  func.func @transform_9(%arg0: i32) -> (i32, i32) {
    %c0_i32 = arith.constant 0 : i32
    %c0_i32_0 = arith.constant 0 : i32
    %c0_i32_1 = arith.constant 0 : i32
    return %c0_i32, %c0_i32_0 : i32, i32
  }
  func.func @transform_10(%arg0: i32) -> (i32, i32) {
    %c0_i32 = arith.constant 0 : i32
    %c0_i32_0 = arith.constant 0 : i32
    %c0_i32_1 = arith.constant 0 : i32
    return %c0_i32, %c0_i32_0 : i32, i32
  }
  func.func @transform_11(%arg0: i32) -> (i32, i32, i32) {
    %c0_i32 = arith.constant 0 : i32
    %c0_i32_0 = arith.constant 0 : i32
    %c0_i32_1 = arith.constant 0 : i32
    return %arg0, %c0_i32, %c0_i32_0 : i32, i32, i32
  }
  func.func @transform_12(%arg0: i32) -> (i32, i32, i32) {
    %c0_i32 = arith.constant 0 : i32
    %c0_i32_0 = arith.constant 0 : i32
    %c0_i32_1 = arith.constant 0 : i32
    return %arg0, %c0_i32, %c0_i32_0 : i32, i32, i32
  }
  func.func @transform_13(%arg0: i32) -> (i32, i32, i32) {
    %c0_i32 = arith.constant 0 : i32
    %c0_i32_0 = arith.constant 0 : i32
    %c0_i32_1 = arith.constant 0 : i32
    return %arg0, %c0_i32, %c0_i32_0 : i32, i32, i32
  }
  func.func @transform_14(%arg0: i32) -> (i32, i32, i32) {
    %c0_i32 = arith.constant 0 : i32
    %c0_i32_0 = arith.constant 0 : i32
    %c0_i32_1 = arith.constant 0 : i32
    return %arg0, %c0_i32, %c0_i32_0 : i32, i32, i32
  }
  func.func @transform_15(%arg0: i32) -> (i32, i32, i32) {
    %c0_i32 = arith.constant 0 : i32
    %c0_i32_0 = arith.constant 0 : i32
    %c0_i32_1 = arith.constant 0 : i32
    return %arg0, %c0_i32, %c0_i32_0 : i32, i32, i32
  }
  func.func @transform_16(%arg0: i32) -> (i32, i32, i32) {
    %c0_i32 = arith.constant 0 : i32
    %c0_i32_0 = arith.constant 0 : i32
    %c0_i32_1 = arith.constant 0 : i32
    return %arg0, %c0_i32, %c0_i32_0 : i32, i32, i32
  }
  func.func @transform_17(%arg0: i32) -> (i32, i32, i32) {
    %c0_i32 = arith.constant 0 : i32
    %c0_i32_0 = arith.constant 0 : i32
    %c0_i32_1 = arith.constant 0 : i32
    return %arg0, %c0_i32, %c0_i32_0 : i32, i32, i32
  }
  func.func @transform_18(%arg0: i32) -> (i32, i32, i32) {
    %c0_i32 = arith.constant 0 : i32
    %c0_i32_0 = arith.constant 0 : i32
    %c0_i32_1 = arith.constant 0 : i32
    return %arg0, %c0_i32, %c0_i32_0 : i32, i32, i32
  }
  func.func @transform_19(%arg0: i32) -> (i32, i32, i32) {
    %c0_i32 = arith.constant 0 : i32
    %c0_i32_0 = arith.constant 0 : i32
    %c0_i32_1 = arith.constant 0 : i32
    return %arg0, %c0_i32, %c0_i32_0 : i32, i32, i32
  }
  func.func @transform_20(%arg0: i32) -> (i32, i32, i32) {
    %c0_i32 = arith.constant 0 : i32
    %c0_i32_0 = arith.constant 0 : i32
    %c0_i32_1 = arith.constant 0 : i32
    return %arg0, %c0_i32, %c0_i32_0 : i32, i32, i32
  }
  func.func @transform_21(%arg0: i32) -> (i32, i32, i32) {
    %c0_i32 = arith.constant 0 : i32
    %c0_i32_0 = arith.constant 0 : i32
    %c0_i32_1 = arith.constant 0 : i32
    return %arg0, %c0_i32, %c0_i32_0 : i32, i32, i32
  }
  func.func @transform_22(%arg0: i32) -> (i32, i32, i32) {
    %c0_i32 = arith.constant 0 : i32
    %c0_i32_0 = arith.constant 0 : i32
    %c0_i32_1 = arith.constant 0 : i32
    return %arg0, %c0_i32, %c0_i32_0 : i32, i32, i32
  }
  func.func @transform_23(%arg0: i32) -> (i32, i32) {
    %c0_i32 = arith.constant 0 : i32
    %c0_i32_0 = arith.constant 0 : i32
    %c0_i32_1 = arith.constant 0 : i32
    return %c0_i32, %c0_i32_0 : i32, i32
  }
}

</mosaic_0001>

<bundles_post_ra>
// kernel: transformer_model_forward.1
= control target key start
LH: loop header
LB: loop body
LE: loop exit
PB: predicated region body
PF: predicated region fallthrough
CT: control target
= control target key end

     0   :  { %s3923_s0 = inlined_call_operand.vmem [shape: bf16[16,4], index: 0, kind: input, shape index: {}]   ;;  %s3924_s1 = inlined_call_operand.vmem [shape: f32[2,8], index: 1, kind: input, shape index: {}]   ;;  %s3925_s2 = inlined_call_operand.vmem [shape: f32[16,8], index: 2, kind: input, shape index: {}]   ;;  %s3926_s3 = inlined_call_operand.vmem [shape: bf16[8,8], index: 3, kind: input, shape index: {}]   ;;  %s3927_s4 = inlined_call_operand.vmem [shape: f32[1,8], index: 4, kind: input, shape index: {}]   ;;  %s3928_s5 = inlined_call_operand.vmem [shape: bf16[8,32], index: 5, kind: input, shape index: {}]   ;;  %s3929_s6 = inlined_call_operand.vmem [shape: bf16[4,32], index: 6, kind: input, shape index: {}]   ;;  %s3930_s7 = inlined_call_operand.vmem [shape: bf16[8,32], index: 7, kind: input, shape index: {}]   ;;  %s3931_s8 = inlined_call_operand.vmem [shape: f32[1,32], index: 8, kind: input, shape index: {}]   ;;  %s3932_s9 = inlined_call_operand.vmem [shape: bf16[32,128], index: 9, kind: input, shape index: {}]   ;;  %s3933_s10 = inlined_call_operand.vmem [shape: f32[1,128], index: 10, kind: input, shape index: {}]   ;;  %s3934_s11 = inlined_call_operand.vmem [shape: bf16[2,32,96], index: 11, kind: input, shape index: {}]   ;;  %s3935_s12 = inlined_call_operand.vmem [shape: f32[2,1,96], index: 12, kind: input, shape index: {}]   ;;  %s3936_s13 = inlined_call_operand.vmem [shape: bf16[2,32,32], index: 13, kind: input, shape index: {}]   ;;  %s3937_s14 = inlined_call_operand.vmem [shape: f32[2,1,32], index: 14, kind: input, shape index: {}]   ;;  %s3938_s15 = inlined_call_operand.vmem [shape: f32[2,1,32], index: 15, kind: input, shape index: {}]   ;;  %s3939_s16 = inlined_call_operand.vmem [shape: f32[2,1,32], index: 16, kind: input, shape index: {}]   ;;  %s3940_s17 = inlined_call_operand.vmem [shape: bf16[2,32,64], index: 17, kind: input, shape index: {}]   ;;  %s3941_s18 = inlined_call_operand.vmem [shape: f32[2,1,64], index: 18, kind: input, shape index: {}]   ;;  %s3942_s19 = inlined_call_operand.vmem [shape: bf16[2,64,32], index: 19, kind: input, shape index: {}]   ;;  %s3943_s20 = inlined_call_operand.vmem [shape: f32[2,1,32], index: 20, kind: input, shape index: {}]   ;;  %s3944_s21 = inlined_call_operand.vmem [shape: f32[2,1,32], index: 21, kind: input, shape index: {}]   ;;  %s3945_s22 = inlined_call_operand.vmem [shape: f32[2,1,32], index: 22, kind: input, shape index: {}]   ;;  %s3946_s23 = inlined_call_operand.vmem [shape: f32[32,128], index: 23, kind: output, shape index: {}]  }
   0x1   :  { %3952 = sst [smem:[#allocation6_spill]] %s3923_s0 }
   0x2   :  { %3953 = sst [smem:[#allocation7_spill]] %s3924_s1 }
   0x3   :  { %3954 = sst [smem:[#allocation8_spill]] %s3925_s2 }
   0x4   :  { %3955 = sst [smem:[#allocation9_spill]] %s3926_s3 }
   0x5   :  { %3956 = sst [smem:[#allocation10_spill]] %s3927_s4  ;;  %s3507_s4 = smov 0  }
   0x6   :  { %3957 = sst [smem:[#allocation11_spill]] %s3928_s5 }
   0x7   :  { %3958 = sst [smem:[#allocation12_spill]] %s3929_s6 }
   0x8   :  { %3959 = sst [smem:[#allocation13_spill]] %s3930_s7 }
   0x9   :  { %3960 = sst [smem:[#allocation14_spill]] %s3932_s9 }
   0xa   :  { %3961 = sst [smem:[#allocation15_spill]] %s3933_s10 }
   0xb   :  { %3962 = sst [smem:[#allocation16_spill]] %s3934_s11 }
   0xc   :  { %3963 = sst [smem:[#allocation17_spill]] %s3936_s13 }
   0xd   :  { %3964 = sst [smem:[#allocation18_spill]] %s3946_s23 }
   0xe LB: > { %3965 = sst [smem:[#allocation4_spill]] %s3366_s4  ;;  %s3513_s30 = sadd.s32 4294967295, %s3366_s4   ;;  %s3366_s4 = sphi %s3507_s4, %s33_s4  }
   0xf   : > { %p2904_p0 = scmp.ge.s32.totalorder %s3366_s4, 1  ;;  %p726_p1 = scmp.lt.s32.totalorder %s3366_s4, 3 }
  0x11   : > { %p727_p2 = pnand %p2904_p0, %p726_p1 }
  0x13   : > { %730 = sbr.rel (%p727_p2) target bundleno = 4692 (0x1254), region = 112 }
  0x18   : > { %p824_p3 = scmp.lt.s32.totalorder %s3513_s30, 1  ;;  %s3966_s11 = sld [smem:[#allocation16_spill]] }
  0x19   : > { %s3967_s13 = sld [smem:[#allocation17_spill]]  ;;  %p2913_p4 = scmp.ne.s32.totalorder %s3513_s30, 0 }
  0x1a   : > { %s3519_s24 = scalar_select %p824_p3, %s3513_s30, 1 }
  0x1b   : > { %s3969_s3 = sld [smem:[#allocation9_spill]] (!%p2913_p4) }
  0x1c   : > { %s2972_s25 = sshll.u32 %s3519_s24, 4  ;;  %s861_s5 = scalar_lea.vmem %s3943_s20, %s3519_s24 }
  0x1d   : > { %s864_s2 = scalar_lea.vmem %s3944_s21, %s3519_s24  ;;  %s867_s9 = scalar_lea.vmem %s3945_s22, %s3519_s24 }
  0x1e   : > { %s3529_s27 = scalar_lea.vmem %s3966_s11, %s2972_s25  ;;  %s3551_s11 = scalar_lea.vmem %s3940_s17, %s2972_s25 }
  0x1f   : > { %s3534_s29 = scalar_lea.vmem %s3967_s13, %s2972_s25  ;;  %s853_s13 = scalar_lea.vmem %s3941_s18, %s3519_s24 }
  0x20   : > { %3968 = sst [smem:[#allocation5_spill]] %s3534_s29  ;;  %s2975_s29 = sshll.u32 %s3519_s24, 5 }
  0x21   : > { %s3561_s4 = scalar_lea.vmem %s3942_s19, %s2975_s29  ;;  %872 = sbr.rel (%p2913_p4) target bundleno = 474 (0x1da), region = 116 }
  0x22   : > { %s3970_s0 = sld [smem:[#allocation7_spill]] (!%p2913_p4) }
  0x23   : > { %s3971_s1 = sld [smem:[#allocation11_spill]] (!%p2913_p4) }
  0x24   : > { %s3972_s7 = sld [smem:[#allocation8_spill]] (!%p2913_p4) }
  0x25   : > { %s3975_s28 = sld [smem:[#allocation13_spill]] (!%p2913_p4) }
  0x26   : > { %v894_v0 = vld [vmem:[%s3969_s3] sm:$0xf]  ;;  %vm906_vm0 = vcmask 1043456   ;;  %v3368_v1 = vmov 0.0   ;;  %vm3369_vm1 = vmmov 0   ;;  %vm902_vm2 = vcmask 64512  }
  0x27   : > { %3038 = vmatprep.subr.bf16.mxu0 %v3368_v1  ;;  %v908_v2 = vsel %vm906_vm0, %v894_v0, 0  ;;  %3040 = vmatprep.mubr.msk.bf16.mxu0 %vm3369_vm1, %v3368_v1  ;;  %vm1027_vm3 = vcmask 1041408   ;;  %vm1023_vm4 = vcmask 31744   ;;  %v873_v15 = vlaneseq  ;;  %s3976_s29 = sld [smem:[#allocation10_spill]]  ;;  %v2917_v32 = vld [vmem:[%s3931_s8] ss:$0 sm:$0xff] }
  0x28   : > { %v892_v3 = vld [vmem:[%s3970_s0] sm:$0x3]  ;;  %3039 = vmatpush3.bf16.msra.mxu0 %v908_v2  ;;  %3044 = vmatprep.subr.bf16.mxu1 %v3368_v1  ;;  %s3973_s0 = sld [smem:[#allocation12_spill]]  ;;  %vm889_vm5 = vcmask 130048   ;;  %v3370_v18 = vmov -1e+09  }
  0x29   : > { %v893_v4 = vpack.c.bf16 %v892_v3, %v892_v3  ;;  %3046 = vmatprep.mubr.msk.bf16.mxu1 %vm3369_vm1, %v3368_v1  ;;  %3050 = vmatprep.subr.bf16.mxu0 %v3368_v1  ;;  %v960_v5 = vld [vmem:[%s3971_s1] sm:$0xf]  ;;  %s3974_s1 = sld [smem:[#allocation6_spill]]  ;;  %891 = vst.msk [vmem:[#allocation3 + $0x8] sm:$0xff] %vm889_vm5, %v3368_v1  ;;  %v874_v16 = vshrl.u32 %v873_v15, 7  ;;  %v877_v17 = vand.u32 127, %v873_v15 }
  0x2a   : > { %v972_v6 = vsel %vm906_vm0, %v960_v5, 0  ;;  %v957_v7 = vld [vmem:[%s3972_s7] sm:$0xff]  ;;  %v958_v8 = vld [vmem:[%s3972_s7 + $0x8] sm:$0xff]  ;;  %vm1126_vm9 = vcmask 261120  }
  0x2b   : > { %3041 = vmatmul.mubr.msk.bf16.vlgmr.msra.gmra.mxu0 %vm902_vm2, %v893_v4  ;;  %3045 = vmatpush3.bf16.msra.mxu1 %v972_v6  ;;  %v959_v9 = vpack.c.bf16 %v958_v8, %v957_v7  ;;  %v1073_v13 = vld [vmem:[%s3975_s28] sm:$0xf]  ;;  %vm880_vm6 = vcmp.lt.s32.totalorder %v877_v17, 8  ;;  %vm881_vm7 = vcmp.le.s32.totalorder %v877_v17, %v874_v16  ;;  %v1122_v43 = vsub.s32 0, %v874_v16 }
  0x2c   : > { %3052 = vmatprep.mubr.msk.bf16.mxu0 %vm3369_vm1, %v3368_v1  ;;  %3056 = vmatprep.subr.bf16.mxu1 %v3368_v1  ;;  %v1078_v14 = vsel %vm906_vm0, %v1073_v13, 0  ;;  %vm883_vm8 = vmand %vm880_vm6, %vm881_vm7  ;;  %v1131_v44 = vsub.s32 1, %v874_v16 }
  0x2d   : > { %v887_v19 = vsel %vm883_vm8, 0.0, %v3370_v18  ;;  %v2914_v20 = vld [vmem:[%s3976_s29] ss:$0 sm:$0xff] }
  0x2e   : > { %3047 = vmatmul.mubr.msk.bf16.vlgmr.msra.gmra.mxu1 %vm902_vm2, %v959_v9  ;;  %v1017_v10 = vld [vmem:[%s3973_s0] sm:$0x3]  ;;  %890 = vst.msk [vmem:[#allocation3] sm:$0xff] %vm889_vm5, %v887_v19 }
  0x2f   : > { %3058 = vmatprep.mubr.msk.bf16.mxu1 %vm3369_vm1, %v3368_v1  ;;  %v1029_v11 = vsel %vm1027_vm3, %v1017_v10, 0  ;;  %v3229_v12 = vld [vmem:[%s3974_s1] sm:$0xff]   ;;  %3057 = vmatpush3.bf16.msra.mxu1 %v1078_v14 }
  0x30   : > { %3051 = vmatpush3.bf16.msra.mxu0 %v1029_v11 }
  0x33   : > { %3053 = vmatmul.mubr.msk.bf16.vlgmr.msra.gmra.mxu0 %vm1023_vm4, %v3229_v12 }
  0xeb   : > { %v944_v21 = vpop.f32.mrf.mxu0 }
  0xec   : > { %v945_v22 = vadd.f32 %v2914_v20, %v944_v21 }
  0xed   : > { %v3042_v23 = vpop.f32.mrf.mxu0 }
  0xee   : > { %v2916_v24 = vmul.f32 -1.442695, %v945_v22  ;;  %v1008_v33 = vpop.f32.mrf.mxu1 }
  0xef   : > { %v947_v25 = vpop.f32.mrf.mxu0  ;;  %v1009_v34 = vadd.f32 %v2917_v32, %v1008_v33 }
  0xf0   : > { %3230 = vpow2.f32 %v2916_v24  ;;  %v3048_v35 = vpop.f32.mrf.mxu1 }
  0xf1   : > { %v3043_v26 = vpop.f32.mrf.mxu0 }
  0xf2   : > { %v1011_v36 = vpop.f32.mrf.mxu1 }
  0xf3   : > { %v1012_v37 = vadd.f32 %v2917_v32, %v1011_v36  ;;  %v1065_v39 = vpop.f32.mrf.mxu0 }
  0xf4   : > { %v3049_v38 = vpop.f32.mrf.mxu1 }
  0xf5   : > { %1128 = vst.msk [vmem:[#allocation2 + $0x8] sm:$0xff] %vm1126_vm9, %v1012_v37  ;;  %1136 = vst.msk [vmem:[#allocation2 + $0x18] sm:$0xff] %vm1126_vm9, %v1012_v37  ;;  %v3054_v40 = vpop.f32.mrf.mxu0 }
  0xf7   : > { %v1068_v41 = vpop.f32.mrf.mxu0 }
  0xf9   : > { %v3055_v42 = vpop.f32.mrf.mxu0 }
  0xfd   : > { %v3231_v27 = vpop.eup %3230 }
  0xfe   : > { %v953_v28 = vadd.f32 1.0, %v3231_v27 }
 0x100   : > { %3232 = vrcp.f32 %v953_v28 }
 0x10d   : > { %v3233_v29 = vpop.eup %3232 }
 0x10e   : > { %v956_v30 = vmul.f32 %v3233_v29, %v945_v22 }
 0x110   : > { %v1072_v31 = vpack.c.bf16 %v956_v30, %v956_v30 }
 0x112   : > { %3059 = vmatmul.mubr.msk.bf16.vlgmr.msra.gmra.mxu1 %vm902_vm2, %v1072_v31 }
 0x1d2   : > { %v1114_v45 = vpop.f32.mrf.mxu1 }
 0x1d3   : > { %v1123_v46 = vrot.slane %v1114_v45, %v1122_v43  ;;  %v1132_v47 = vrot.slane %v1114_v45, %v1131_v44 }
 0x1d4   : > { %v3060_v48 = vpop.f32.mrf.mxu1 }
 0x1d5   : > { %v1124_v49 = vadd.f32 %v1123_v46, %v1065_v39  ;;  %v1133_v50 = vadd.f32 %v1132_v47, %v1068_v41 }
 0x1d6   : > { %v1117_v51 = vpop.f32.mrf.mxu1 }
 0x1d7   : > { %v1125_v52 = vadd.f32 %v1124_v49, %v1009_v34  ;;  %v1134_v53 = vadd.f32 %v1133_v50, %v1009_v34 }
 0x1d8   : > { %v3061_v54 = vpop.f32.mrf.mxu1 }
 0x1d9   : > { %1127 = vst.msk [vmem:[#allocation2] sm:$0xff] %vm1126_vm9, %v1125_v52  ;;  %1135 = vst.msk [vmem:[#allocation2 + $0x10] sm:$0xff] %vm1126_vm9, %v1134_v53 }
 0x1da PF: > { %v3264_v55 = vld [vmem:[%s3529_s27 + $0x8] sm:$0xff]   ;;  %v3265_v56 = vld [vmem:[%s3529_s27] sm:$0xff]   ;;  %vm1166_vm10 = vcmask 261120   ;;  %v1140_v61 = vld [vmem:[#allocation2 + $0x18] sm:$0xff]  ;;  %v3371_v63 = vmov 0.0   ;;  %vm3372_vm11 = vmmov 0   ;;  %s3977_s1 = scalar_lea.vmem %s3935_s12, %s3519_s24 }
 0x1db   : > { %3062 = vmatprep.subr.bf16.mxu0 %v3264_v55  ;;  %v1138_v58 = vld [vmem:[#allocation2 + $0x8] sm:$0xff]  ;;  %3070 = vmatprep.subr.bf16.mxu1 %v3371_v63  ;;  %v2922_v3 = vld [vmem:[%s3977_s1] ss:$0 sm:$0xff]  ;;  %s3373_s25 = smov 96   ;;  %vm1229_vm12 = vcmask 64512   ;;  %vm1327_vm13 = vcmask 130048  }
 0x1dc   : > { %3063 = vmatpush3.bf16.msra.mxu0 %v3264_v55  ;;  %3072 = vmatprep.mubr.msk.bf16.mxu1 %vm3372_vm11, %v3371_v63  ;;  %v3653_v15 = vld [vmem:[#allocation3] sm:$0xff]  ;;  %v3656_v19 = vld [vmem:[#allocation3 + $0x8] sm:$0xff]  ;;  %s3374_s6 = smov 64   ;;  %s3375_s28 = smov 88   ;;  %vm2250_vm14 = vcmask 195584   ;;  %vm2539_vm15 = vcmask 523264  }
 0x1dd   : > { %3064 = vmatprep.subr.bf16.mxu0 %v3265_v56  ;;  %s3376_s3 = smov 120   ;;  %s3377_s26 = smov 56  }
 0x1de   : > { %s3378_s29 = smov 80   ;;  %s3379_s0 = smov 112  }
 0x1df   : > { %s3380_s10 = smov 48   ;;  %s3381_s27 = smov 72  }
 0x1e0   : > { %v1137_v57 = vld [vmem:[#allocation2] sm:$0xff]  ;;  %v1139_v59 = vld [vmem:[#allocation2 + $0x10] sm:$0xff]  ;;  %3065 = vmatpush3.bf16.msra.mxu0 %v3265_v56  ;;  %s3382_s23 = smov 104   ;;  %s3383_s1 = smov 40  }
 0x1e1   : > { %v1141_v60 = vpack.c.bf16 %v1138_v58, %v1137_v57  ;;  %v1142_v62 = vpack.c.bf16 %v1140_v61, %v1139_v59  ;;  %3076 = vmatprep.subr.bf16.mxu0 %v3371_v63  ;;  %p2964_p5 = scmp.ne.s32.totalorder %s3513_s30, 1 }
 0x1e3   : > { %3066 = vmatprep.mubr.msk.bf16.mxu0 %vm1166_vm10, %v1141_v60 }
 0x1e4   : > { %3067 = vmatmul.mubr.msk.bf16.vlgmr.msra.gmra.mxu0 %vm1166_vm10, %v1142_v62 }
 0x1e5   : > { %3078 = vmatprep.mubr.msk.bf16.mxu0 %vm3372_vm11, %v3371_v63 }
 0x2a4   : > { %v3068_v0 = vpop.f32.mrf.mxu0 }
 0x2a5   : > { %v1216_v9 = vadd.f32 %v3068_v0, %v2922_v3 }
 0x2a6   : > { %v1207_v1 = vpop.f32.mrf.mxu0 }
 0x2a7   : > { %v1208_v5 = vadd.f32 %v2922_v3, %v1207_v1 }
 0x2a8   : > { %v3069_v2 = vpop.f32.mrf.mxu0 }
 0x2a9   : > { %v1219_v7 = vadd.f32 %v3069_v2, %v2922_v3 }
 0x2aa   : > { %v1210_v4 = vpop.f32.mrf.mxu0 }
 0x2ab   : > { %v1211_v6 = vadd.f32 %v2922_v3, %v1210_v4  ;;  %v3638_v10 = vpack.c.bf16 %v1219_v7, %v1216_v9 }
 0x2ad   : > { %v3635_v8 = vpack.c.bf16 %v1211_v6, %v1208_v5 }
 0x2af   : > { %1227 = vrot.lane.b32.xlu0 %v3635_v8, %s3373_s25 }
 0x2b3   : > { %1278 = vrot.lane.b32.xlu0 %v3638_v10, %s3373_s25  ;;  %s3384_s25 = smov 8  }
 0x321   : > { %v1228_v11 = vpop.permute.xlu0 %1227 }
 0x322   : > { %v1234_v12 = vsel %vm1229_vm12, %v1228_v11, 0 }
 0x323   : > { %3071 = vmatpush3.bf16.xpose.msra.mxu1 %v1234_v12 }
 0x324   : > { %3082 = vmatprep.subr.bf16.mxu1 %v3371_v63 }
 0x325   : > { %v1279_v13 = vpop.permute.xlu0 %1278 }
 0x326   : > { %v1284_v14 = vsel %vm1229_vm12, %v1279_v13, 0 }
 0x327   : > { %3077 = vmatpush3.bf16.xpose.msra.mxu0 %v1284_v14 }
 0x328   : > { %3088 = vmatprep.subr.bf16.mxu0 %v3371_v63 }
 0x32a   : > { %3073 = vmatmul.mubr.msk.bf16.vlgmr.msra.gmra.mxu1 %vm1229_vm12, %v3635_v8 }
 0x32b   : > { %3084 = vmatprep.mubr.msk.bf16.mxu1 %vm3372_vm11, %v3371_v63 }
 0x32e   : > { %3079 = vmatmul.mubr.msk.bf16.vlgmr.msra.gmra.mxu0 %vm1229_vm12, %v3638_v10 }
 0x32f   : > { %3090 = vmatprep.mubr.msk.bf16.mxu0 %vm3372_vm11, %v3371_v63 }
 0x3ea   : > { %v1270_v16 = vpop.f32.mrf.mxu1 }
 0x3eb   : > { %v1271_v17 = vadd.f32 %v1270_v16, %v3653_v15 }
 0x3ec   : > { %v3074_v18 = vpop.f32.mrf.mxu1 }
 0x3ed   : > { %v1328_v20 = vsel %vm1327_vm13, %v1271_v17, -inf }
 0x3ee   : > { %1329 = vmax.xlane.f32.xlu1 %v1328_v20  ;;  %v1273_v21 = vpop.f32.mrf.mxu1  ;;  %v1320_v22 = vpop.f32.mrf.mxu0 }
 0x3ef   : > { %v1274_v23 = vadd.f32 %v1273_v21, %v3656_v19  ;;  %v1321_v24 = vadd.f32 %v1320_v22, %v3653_v15 }
 0x3f0   : > { %v3075_v25 = vpop.f32.mrf.mxu1  ;;  %v3080_v26 = vpop.f32.mrf.mxu0 }
 0x3f1   : > { %v1331_v27 = vsel %vm1327_vm13, %v1274_v23, -inf  ;;  %v1334_v28 = vsel %vm1327_vm13, %v1321_v24, -inf }
 0x3f2   : > { %1332 = vmax.xlane.f32.xlu1 %v1331_v27  ;;  %1335 = vmax.xlane.f32.xlu0 %v1334_v28  ;;  %v1323_v29 = vpop.f32.mrf.mxu0 }
 0x3f3   : > { %v1324_v30 = vadd.f32 %v1323_v29, %v3656_v19 }
 0x3f4   : > { %v3081_v31 = vpop.f32.mrf.mxu0 }
 0x3f5   : > { %v1337_v32 = vsel %vm1327_vm13, %v1324_v30, -inf }
 0x3f6   : > { %1338 = vmax.xlane.f32.xlu1 %v1337_v32 }
 0x407   : > { %1374 = vrot.lane.b32.xlu1 %v3635_v8, %s3374_s6 }
 0x408   : > { %1421 = vrot.lane.b32.xlu0 %v3638_v10, %s3374_s6  ;;  %s3385_s6 = smov 16  }
 0x40b   : > { %1470 = vrot.lane.b32.xlu1 %v3635_v8, %s3375_s28 }
 0x40f   : > { %1521 = vrot.lane.b32.xlu1 %v3638_v10, %s3375_s28  ;;  %s3978_s28 = sld [smem:[#allocation5_spill]] }
 0x477   : > { %v1330_v33 = vpop.xlane.xlu1 %1329 }
 0x478   : > { %v1340_v34 = vsub.f32 %v1271_v17, %v1330_v33 }
 0x47a   : > { %v1344_v39 = vmul.f32 1.442695, %v1340_v34 }
 0x47b   : > { %v1333_v35 = vpop.xlane.xlu1 %1332  ;;  %v1336_v36 = vpop.xlane.xlu0 %1335 }
 0x47c   : > { %v1342_v37 = vsub.f32 %v1321_v24, %v1336_v36  ;;  %v1341_v43 = vsub.f32 %v1274_v23, %v1333_v35 }
 0x47e   : > { %v1348_v38 = vmul.f32 1.442695, %v1342_v37  ;;  %v1346_v46 = vmul.f32 1.442695, %v1341_v43 }
 0x47f   : > { %v1422_v40 = vpop.permute.xlu0 %1421  ;;  %v1339_v41 = vpop.xlane.xlu1 %1338 }
 0x480   : > { %v1343_v42 = vsub.f32 %v1324_v30, %v1339_v41  ;;  %3089 = vmatpush3.bf16.msra.mxu0 %v1422_v40  ;;  %3274 = vpow2.f32 %v1348_v38 }
 0x481   : > { %3100 = vmatprep.subr.bf16.mxu0 %v3371_v63  ;;  %3276 = vpow2.f32 %v1344_v39 }
 0x482   : > { %v1350_v44 = vmul.f32 1.442695, %v1343_v42 }
 0x483   : > { %v1375_v45 = vpop.permute.xlu1 %1374 }
 0x484   : > { %3083 = vmatpush3.bf16.msra.mxu1 %v1375_v45  ;;  %3278 = vpow2.f32 %v1350_v44 }
 0x485   : > { %3094 = vmatprep.subr.bf16.mxu1 %v3371_v63  ;;  %3280 = vpow2.f32 %v1346_v46 }
 0x487   : > { %v1471_v55 = vpop.permute.xlu1 %1470 }
 0x488   : > { %v1476_v12 = vsel %vm1229_vm12, %v1471_v55, 0 }
 0x48b   : > { %v1522_v56 = vpop.permute.xlu1 %1521 }
 0x48c   : > { %v1527_v5 = vsel %vm1229_vm12, %v1522_v56, 0 }
 0x48d   : > { %v3275_v47 = vpop.eup %3274 }
 0x48e   : > { %v1358_v48 = vsel %vm1327_vm13, %v3275_v47, 0.0  ;;  %v3277_v49 = vpop.eup %3276 }
 0x48f   : > { %1359 = vadd.xlane.f32.xlu1 %v1358_v48  ;;  %v1352_v50 = vsel %vm1327_vm13, %v3277_v49, 0.0 }
 0x491   : > { %v3279_v51 = vpop.eup %3278 }
 0x492   : > { %v1361_v52 = vsel %vm1327_vm13, %v3279_v51, 0.0  ;;  %v3281_v53 = vpop.eup %3280 }
 0x493   : > { %1353 = vadd.xlane.f32.xlu1 %v1352_v50  ;;  %v1355_v54 = vsel %vm1327_vm13, %v3281_v53, 0.0 }
 0x497   : > { %1362 = vadd.xlane.f32.xlu1 %v1361_v52 }
 0x49b   : > { %1356 = vadd.xlane.f32.xlu1 %v1355_v54 }
 0x4ac   : > { %1468 = vrot.lane.b32.xlu1 %v3635_v8, %s3376_s3 }
 0x4b0   : > { %1519 = vrot.lane.b32.xlu1 %v3638_v10, %s3376_s3  ;;  %s3386_s3 = smov 24  }
 0x518   : > { %v1360_v57 = vpop.xlane.xlu1 %1359 }
 0x519   : > { %3282 = vrcp.f32 %v1360_v57 }
 0x51c   : > { %v1354_v58 = vpop.xlane.xlu1 %1353 }
 0x520   : > { %v1363_v59 = vpop.xlane.xlu1 %1362 }
 0x521   : > { %3284 = vrcp.f32 %v1363_v59 }
 0x522   : > { %3286 = vrcp.f32 %v1354_v58 }
 0x524   : > { %v1357_v60 = vpop.xlane.xlu1 %1356 }
 0x525   : > { %3288 = vrcp.f32 %v1357_v60 }
 0x526   : > { %v3283_v61 = vpop.eup %3282 }
 0x527   : > { %v1370_v0 = vmul.f32 %v3283_v61, %v3275_v47 }
 0x528   : > { %v1469_v9 = vpop.permute.xlu1 %1468 }
 0x52c   : > { %v1520_v13 = vpop.permute.xlu1 %1519 }
 0x52e   : > { %v3285_v62 = vpop.eup %3284 }
 0x52f   : > { %v1371_v1 = vmul.f32 %v3285_v62, %v3279_v51  ;;  %v3287_v2 = vpop.eup %3286 }
 0x530   : > { %v1368_v6 = vmul.f32 %v3287_v2, %v3277_v49 }
 0x531   : > { %v1373_v3 = vpack.c.bf16 %v1371_v1, %v1370_v0 }
 0x532   : > { %v3289_v4 = vpop.eup %3288 }
 0x533   : > { %3091 = vmatmul.mubr.msk.bf16.vlgmr.msra.gmra.mxu0 %vm1327_vm13, %v1373_v3  ;;  %v1369_v7 = vmul.f32 %v3289_v4, %v3281_v53 }
 0x534   : > { %3101 = vmatpush3.bf16.xpose.msra.mxu0 %v1527_v5  ;;  %3102 = vmatprep.mubr.msk.bf16.mxu0 %vm3372_vm11, %v3371_v63 }
 0x535   : > { %v1372_v11 = vpack.c.bf16 %v1369_v7, %v1368_v6  ;;  %3112 = vmatprep.subr.bf16.mxu0 %v3371_v63 }
 0x537   : > { %3085 = vmatmul.mubr.msk.bf16.vlgmr.msra.gmra.mxu1 %vm1327_vm13, %v1372_v11 }
 0x538   : > { %3095 = vmatpush3.bf16.xpose.msra.mxu1 %v1476_v12  ;;  %3096 = vmatprep.mubr.msk.bf16.mxu1 %vm3372_vm11, %v3371_v63 }
 0x539   : > { %3106 = vmatprep.subr.bf16.mxu1 %v3371_v63 }
 0x53b   : > { %3103 = vmatmul.mubr.msk.bf16.vlgmr.msra.gmra.mxu0 %vm1229_vm12, %v1520_v13 }
 0x53c   : > { %3114 = vmatprep.mubr.msk.bf16.mxu0 %vm3372_vm11, %v3371_v63 }
 0x53f   : > { %3097 = vmatmul.mubr.msk.bf16.vlgmr.msra.gmra.mxu1 %vm1229_vm12, %v1469_v9 }
 0x540   : > { %3108 = vmatprep.mubr.msk.bf16.mxu1 %vm3372_vm11, %v3371_v63 }
 0x5f3   : > { %v3693_v14 = vpop.f32.mrf.mxu0 }
 0x5f5   : > { %v3092_v16 = vpop.f32.mrf.mxu0 }
 0x5f7   : > { %v3695_v17 = vpop.f32.mrf.mxu1  ;;  %v3697_v18 = vpop.f32.mrf.mxu0 }
 0x5f9   : > { %v3086_v20 = vpop.f32.mrf.mxu1  ;;  %v3093_v21 = vpop.f32.mrf.mxu0 }
 0x5fb   : > { %v3699_v22 = vpop.f32.mrf.mxu1  ;;  %v1563_v23 = vpop.f32.mrf.mxu0 }
 0x5fc   : > { %v1564_v31 = vadd.f32 %v1563_v23, %v3653_v15 }
 0x5fd   : > { %v3087_v24 = vpop.f32.mrf.mxu1  ;;  %v3104_v25 = vpop.f32.mrf.mxu0 }
 0x5fe   : > { %v1576_v38 = vsel %vm1327_vm13, %v1564_v31, -inf }
 0x5ff   : > { %v1512_v26 = vpop.f32.mrf.mxu1  ;;  %v1566_v27 = vpop.f32.mrf.mxu0 }
 0x600   : > { %v1513_v28 = vadd.f32 %v1512_v26, %v3653_v15  ;;  %v1567_v36 = vadd.f32 %v1566_v27, %v3656_v19 }
 0x601   : > { %v3098_v29 = vpop.f32.mrf.mxu1  ;;  %v3105_v30 = vpop.f32.mrf.mxu0 }
 0x602   : > { %v1570_v32 = vsel %vm1327_vm13, %v1513_v28, -inf  ;;  %v1579_v39 = vsel %vm1327_vm13, %v1567_v36, -inf }
 0x603   : > { %1571 = vmax.xlane.f32.xlu0 %v1570_v32  ;;  %v1515_v33 = vpop.f32.mrf.mxu1 }
 0x604   : > { %v1516_v34 = vadd.f32 %v1515_v33, %v3656_v19 }
 0x605   : > { %v3099_v35 = vpop.f32.mrf.mxu1 }
 0x606   : > { %v1573_v37 = vsel %vm1327_vm13, %v1516_v34, -inf }
 0x607   : > { %1574 = vmax.xlane.f32.xlu1 %v1573_v37  ;;  %1577 = vmax.xlane.f32.xlu0 %v1576_v38 }
 0x60b   : > { %1580 = vmax.xlane.f32.xlu0 %v1579_v39 }
 0x618   : > { %1616 = vrot.lane.b32.xlu1 %v3635_v8, %s3377_s26 }
 0x68c   : > { %v1572_v40 = vpop.xlane.xlu0 %1571 }
 0x68d   : > { %v1582_v41 = vsub.f32 %v1513_v28, %v1572_v40 }
 0x68f   : > { %v1586_v47 = vmul.f32 1.442695, %v1582_v41 }
 0x690   : > { %v1575_v42 = vpop.xlane.xlu1 %1574  ;;  %v1578_v43 = vpop.xlane.xlu0 %1577 }
 0x691   : > { %v1584_v44 = vsub.f32 %v1564_v31, %v1578_v43  ;;  %v1583_v45 = vsub.f32 %v1516_v34, %v1575_v42 }
 0x693   : > { %v1590_v46 = vmul.f32 1.442695, %v1584_v44  ;;  %v1588_v51 = vmul.f32 1.442695, %v1583_v45 }
 0x694   : > { %v1617_v48 = vpop.permute.xlu1 %1616  ;;  %v1581_v49 = vpop.xlane.xlu0 %1580 }
 0x695   : > { %v1585_v50 = vsub.f32 %v1567_v36, %v1581_v49  ;;  %3107 = vmatpush3.bf16.msra.mxu1 %v1617_v48  ;;  %3290 = vpow2.f32 %v1590_v46 }
 0x696   : > { %3118 = vmatprep.subr.bf16.mxu1 %v3371_v63  ;;  %3292 = vpow2.f32 %v1586_v47 }
 0x697   : > { %v1592_v52 = vmul.f32 1.442695, %v1585_v50 }
 0x699   : > { %3294 = vpow2.f32 %v1592_v52 }
 0x69a   : > { %3296 = vpow2.f32 %v1588_v51 }
 0x6a2   : > { %v3291_v53 = vpop.eup %3290 }
 0x6a3   : > { %v1600_v54 = vsel %vm1327_vm13, %v3291_v53, 0.0  ;;  %v3293_v55 = vpop.eup %3292 }
 0x6a4   : > { %1601 = vadd.xlane.f32.xlu1 %v1600_v54  ;;  %v1594_v59 = vsel %vm1327_vm13, %v3293_v55, 0.0 }
 0x6a6   : > { %v3295_v56 = vpop.eup %3294 }
 0x6a7   : > { %v1603_v57 = vsel %vm1327_vm13, %v3295_v56, 0.0  ;;  %v3297_v58 = vpop.eup %3296 }
 0x6a8   : > { %1604 = vadd.xlane.f32.xlu0 %v1603_v57  ;;  %1595 = vadd.xlane.f32.xlu1 %v1594_v59  ;;  %v1597_v60 = vsel %vm1327_vm13, %v3297_v58, 0.0 }
 0x6ac   : > { %1598 = vadd.xlane.f32.xlu0 %v1597_v60 }
 0x6b9   : > { %1712 = vrot.lane.b32.xlu1 %v3635_v8, %s3378_s29 }
 0x6bd   : > { %1763 = vrot.lane.b32.xlu1 %v3638_v10, %s3378_s29 }
 0x6c1   : > { %1761 = vrot.lane.b32.xlu1 %v3638_v10, %s3379_s0 }
 0x6c2   : > { %1663 = vrot.lane.b32.xlu0 %v3638_v10, %s3377_s26 }
 0x6c6   : > { %1710 = vrot.lane.b32.xlu0 %v3635_v8, %s3379_s0  ;;  %s3979_s0 = scalar_lea.vmem %s3937_s14, %s3519_s24 }
 0x72d   : > { %v1602_v61 = vpop.xlane.xlu1 %1601 }
 0x72e   : > { %3298 = vrcp.f32 %v1602_v61 }
 0x731   : > { %v1605_v62 = vpop.xlane.xlu0 %1604  ;;  %v1596_v0 = vpop.xlane.xlu1 %1595 }
 0x732   : > { %3300 = vrcp.f32 %v1605_v62 }
 0x733   : > { %3302 = vrcp.f32 %v1596_v0 }
 0x735   : > { %v1599_v1 = vpop.xlane.xlu0 %1598  ;;  %v1713_v3 = vpop.permute.xlu1 %1712 }
 0x736   : > { %3304 = vrcp.f32 %v1599_v1  ;;  %v1718_v24 = vsel %vm1229_vm12, %v1713_v3, 0 }
 0x739   : > { %v1664_v2 = vpop.permute.xlu0 %1663  ;;  %v1764_v11 = vpop.permute.xlu1 %1763 }
 0x73a   : > { %3113 = vmatpush3.bf16.msra.mxu0 %v1664_v2  ;;  %v1769_v16 = vsel %vm1229_vm12, %v1764_v11, 0 }
 0x73b   : > { %3124 = vmatprep.subr.bf16.mxu0 %v3371_v63  ;;  %v3299_v4 = vpop.eup %3298 }
 0x73c   : > { %v1612_v6 = vmul.f32 %v3299_v4, %v3291_v53 }
 0x73d   : > { %v1762_v25 = vpop.permute.xlu1 %1761  ;;  %v1711_v26 = vpop.permute.xlu0 %1710 }
 0x73f   : > { %v3301_v5 = vpop.eup %3300 }
 0x740   : > { %v1613_v7 = vmul.f32 %v3301_v5, %v3295_v56  ;;  %v3303_v9 = vpop.eup %3302 }
 0x741   : > { %v1610_v20 = vmul.f32 %v3303_v9, %v3293_v55 }
 0x742   : > { %v1615_v12 = vpack.c.bf16 %v1613_v7, %v1612_v6 }
 0x743   : > { %v3305_v13 = vpop.eup %3304 }
 0x744   : > { %3115 = vmatmul.mubr.msk.bf16.vlgmr.msra.gmra.mxu0 %vm1327_vm13, %v1615_v12  ;;  %v1611_v21 = vmul.f32 %v3305_v13, %v3297_v58 }
 0x745   : > { %3125 = vmatpush3.bf16.xpose.msra.mxu0 %v1769_v16  ;;  %3126 = vmatprep.mubr.msk.bf16.mxu0 %vm3372_vm11, %v3371_v63 }
 0x746   : > { %v1614_v23 = vpack.c.bf16 %v1611_v21, %v1610_v20  ;;  %3136 = vmatprep.subr.bf16.mxu0 %v3371_v63 }
 0x748   : > { %3109 = vmatmul.mubr.msk.bf16.vlgmr.msra.gmra.mxu1 %vm1327_vm13, %v1614_v23 }
 0x749   : > { %3119 = vmatpush3.bf16.xpose.msra.mxu1 %v1718_v24  ;;  %3120 = vmatprep.mubr.msk.bf16.mxu1 %vm3372_vm11, %v3371_v63 }
 0x74a   : > { %3130 = vmatprep.subr.bf16.mxu1 %v3371_v63 }
 0x74c   : > { %3127 = vmatmul.mubr.msk.bf16.vlgmr.msra.gmra.mxu0 %vm1229_vm12, %v1762_v25 }
 0x74d   : > { %3138 = vmatprep.mubr.msk.bf16.mxu0 %vm3372_vm11, %v3371_v63 }
 0x750   : > { %3121 = vmatmul.mubr.msk.bf16.vlgmr.msra.gmra.mxu1 %vm1229_vm12, %v1711_v26 }
 0x751   : > { %3132 = vmatprep.mubr.msk.bf16.mxu1 %vm3372_vm11, %v3371_v63 }
 0x804   : > { %v3739_v27 = vpop.f32.mrf.mxu0 }
 0x806   : > { %v3116_v28 = vpop.f32.mrf.mxu0 }
 0x808   : > { %v3741_v29 = vpop.f32.mrf.mxu1  ;;  %v3743_v30 = vpop.f32.mrf.mxu0 }
 0x809   : > { %v3239_v31 = vpack.i.bf16 %v3743_v30, %v3739_v27 }
 0x80a   : > { %v3110_v32 = vpop.f32.mrf.mxu1  ;;  %v3117_v33 = vpop.f32.mrf.mxu0 }
 0x80c   : > { %v3747_v34 = vpop.f32.mrf.mxu1  ;;  %v1805_v35 = vpop.f32.mrf.mxu0 }
 0x80d   : > { %v3234_v36 = vpack.i.bf16 %v3747_v34, %v3741_v29  ;;  %v1806_v44 = vadd.f32 %v1805_v35, %v3653_v15 }
 0x80e   : > { %v3111_v37 = vpop.f32.mrf.mxu1  ;;  %v3128_v38 = vpop.f32.mrf.mxu0 }
 0x80f   : > { %v1818_v51 = vsel %vm1327_vm13, %v1806_v44, -inf }
 0x810   : > { %v1754_v39 = vpop.f32.mrf.mxu1  ;;  %v1808_v40 = vpop.f32.mrf.mxu0 }
 0x811   : > { %v1755_v41 = vadd.f32 %v1754_v39, %v3653_v15  ;;  %v1809_v49 = vadd.f32 %v1808_v40, %v3656_v19 }
 0x812   : > { %v3122_v42 = vpop.f32.mrf.mxu1  ;;  %v3129_v43 = vpop.f32.mrf.mxu0 }
 0x813   : > { %v1812_v45 = vsel %vm1327_vm13, %v1755_v41, -inf  ;;  %v1821_v52 = vsel %vm1327_vm13, %v1809_v49, -inf }
 0x814   : > { %1813 = vmax.xlane.f32.xlu0 %v1812_v45  ;;  %v1757_v46 = vpop.f32.mrf.mxu1 }
 0x815   : > { %v1758_v47 = vadd.f32 %v1757_v46, %v3656_v19 }
 0x816   : > { %v3123_v48 = vpop.f32.mrf.mxu1 }
 0x817   : > { %v1815_v50 = vsel %vm1327_vm13, %v1758_v47, -inf }
 0x818   : > { %1816 = vmax.xlane.f32.xlu1 %v1815_v50  ;;  %1819 = vmax.xlane.f32.xlu0 %v1818_v51 }
 0x81c   : > { %1822 = vmax.xlane.f32.xlu0 %v1821_v52 }
 0x829   : > { %1858 = vrot.lane.b32.xlu1 %v3635_v8, %s3380_s10 }
 0x89d   : > { %v1814_v53 = vpop.xlane.xlu0 %1813 }
 0x89e   : > { %v1824_v54 = vsub.f32 %v1755_v41, %v1814_v53 }
 0x8a0   : > { %v1828_v60 = vmul.f32 1.442695, %v1824_v54 }
 0x8a1   : > { %v1817_v55 = vpop.xlane.xlu1 %1816  ;;  %v1820_v56 = vpop.xlane.xlu0 %1819 }
 0x8a2   : > { %v1826_v57 = vsub.f32 %v1806_v44, %v1820_v56  ;;  %v1825_v58 = vsub.f32 %v1758_v47, %v1817_v55 }
 0x8a4   : > { %v1832_v59 = vmul.f32 1.442695, %v1826_v57  ;;  %v1830_v1 = vmul.f32 1.442695, %v1825_v58 }
 0x8a5   : > { %v1859_v61 = vpop.permute.xlu1 %1858  ;;  %v1823_v62 = vpop.xlane.xlu0 %1822 }
 0x8a6   : > { %v1827_v0 = vsub.f32 %v1809_v49, %v1823_v62  ;;  %3131 = vmatpush3.bf16.msra.mxu1 %v1859_v61  ;;  %3306 = vpow2.f32 %v1832_v59 }
 0x8a7   : > { %3142 = vmatprep.subr.bf16.mxu1 %v3371_v63  ;;  %3308 = vpow2.f32 %v1828_v60 }
 0x8a8   : > { %v1834_v2 = vmul.f32 1.442695, %v1827_v0 }
 0x8aa   : > { %3310 = vpow2.f32 %v1834_v2 }
 0x8ab   : > { %3312 = vpow2.f32 %v1830_v1 }
 0x8b3   : > { %v3307_v3 = vpop.eup %3306 }
 0x8b4   : > { %v1842_v4 = vsel %vm1327_vm13, %v3307_v3, 0.0  ;;  %v3309_v5 = vpop.eup %3308 }
 0x8b5   : > { %1843 = vadd.xlane.f32.xlu1 %v1842_v4  ;;  %v1836_v11 = vsel %vm1327_vm13, %v3309_v5, 0.0 }
 0x8b7   : > { %v3311_v6 = vpop.eup %3310 }
 0x8b8   : > { %v1845_v7 = vsel %vm1327_vm13, %v3311_v6, 0.0  ;;  %v3313_v9 = vpop.eup %3312 }
 0x8b9   : > { %1846 = vadd.xlane.f32.xlu0 %v1845_v7  ;;  %1837 = vadd.xlane.f32.xlu1 %v1836_v11  ;;  %v1839_v12 = vsel %vm1327_vm13, %v3313_v9, 0.0 }
 0x8bd   : > { %1840 = vadd.xlane.f32.xlu0 %v1839_v12 }
 0x8ca   : > { %1954 = vrot.lane.b32.xlu1 %v3635_v8, %s3381_s27 }
 0x8ce   : > { %2005 = vrot.lane.b32.xlu1 %v3638_v10, %s3381_s27  ;;  %s3980_s27 = scalar_lea.vmem %s3938_s15, %s3519_s24 }
 0x8d2   : > { %2003 = vrot.lane.b32.xlu1 %v3638_v10, %s3382_s23 }
 0x8d3   : > { %1905 = vrot.lane.b32.xlu0 %v3638_v10, %s3380_s10 }
 0x8d7   : > { %1952 = vrot.lane.b32.xlu0 %v3635_v8, %s3382_s23 }
 0x93e   : > { %v1844_v13 = vpop.xlane.xlu1 %1843 }
 0x93f   : > { %3314 = vrcp.f32 %v1844_v13 }
 0x942   : > { %v1847_v16 = vpop.xlane.xlu0 %1846  ;;  %v1838_v20 = vpop.xlane.xlu1 %1837 }
 0x943   : > { %3316 = vrcp.f32 %v1847_v16 }
 0x944   : > { %3318 = vrcp.f32 %v1838_v20 }
 0x946   : > { %v1841_v21 = vpop.xlane.xlu0 %1840  ;;  %v1955_v24 = vpop.permute.xlu1 %1954 }
 0x947   : > { %3320 = vrcp.f32 %v1841_v21  ;;  %v1960_v43 = vsel %vm1229_vm12, %v1955_v24, 0 }
 0x94a   : > { %v1906_v23 = vpop.permute.xlu0 %1905  ;;  %v2006_v35 = vpop.permute.xlu1 %2005 }
 0x94b   : > { %3137 = vmatpush3.bf16.msra.mxu0 %v1906_v23  ;;  %v2011_v39 = vsel %vm1229_vm12, %v2006_v35, 0 }
 0x94c   : > { %3148 = vmatprep.subr.bf16.mxu0 %v3371_v63  ;;  %v3315_v25 = vpop.eup %3314 }
 0x94d   : > { %v1854_v28 = vmul.f32 %v3315_v25, %v3307_v3 }
 0x94e   : > { %v2004_v44 = vpop.permute.xlu1 %2003  ;;  %v1953_v45 = vpop.permute.xlu0 %1952 }
 0x950   : > { %v3317_v26 = vpop.eup %3316 }
 0x951   : > { %v1855_v32 = vmul.f32 %v3317_v26, %v3311_v6  ;;  %v3319_v33 = vpop.eup %3318 }
 0x952   : > { %v1852_v40 = vmul.f32 %v3319_v33, %v3309_v5 }
 0x953   : > { %v1857_v37 = vpack.c.bf16 %v1855_v32, %v1854_v28 }
 0x954   : > { %v3321_v38 = vpop.eup %3320 }
 0x955   : > { %3139 = vmatmul.mubr.msk.bf16.vlgmr.msra.gmra.mxu0 %vm1327_vm13, %v1857_v37  ;;  %v1853_v41 = vmul.f32 %v3321_v38, %v3313_v9 }
 0x956   : > { %3149 = vmatpush3.bf16.xpose.msra.mxu0 %v2011_v39  ;;  %3150 = vmatprep.mubr.msk.bf16.mxu0 %vm3372_vm11, %v3371_v63 }
 0x957   : > { %v1856_v42 = vpack.c.bf16 %v1853_v41, %v1852_v40  ;;  %3160 = vmatprep.subr.bf16.mxu0 %v3371_v63 }
 0x959   : > { %3133 = vmatmul.mubr.msk.bf16.vlgmr.msra.gmra.mxu1 %vm1327_vm13, %v1856_v42 }
 0x95a   : > { %3143 = vmatpush3.bf16.xpose.msra.mxu1 %v1960_v43  ;;  %3144 = vmatprep.mubr.msk.bf16.mxu1 %vm3372_vm11, %v3371_v63 }
 0x95b   : > { %3154 = vmatprep.subr.bf16.mxu1 %v3371_v63 }
 0x95d   : > { %3151 = vmatmul.mubr.msk.bf16.vlgmr.msra.gmra.mxu0 %vm1229_vm12, %v2004_v44 }
 0x95e   : > { %3162 = vmatprep.mubr.msk.bf16.mxu0 %vm3372_vm11, %v3371_v63 }
 0x961   : > { %3145 = vmatmul.mubr.msk.bf16.vlgmr.msra.gmra.mxu1 %vm1229_vm12, %v1953_v45 }
 0x962   : > { %3156 = vmatprep.mubr.msk.bf16.mxu1 %vm3372_vm11, %v3371_v63 }
 0xa15   : > { %v3789_v46 = vpop.f32.mrf.mxu0 }
 0xa17   : > { %v3140_v47 = vpop.f32.mrf.mxu0 }
 0xa19   : > { %v3791_v48 = vpop.f32.mrf.mxu1  ;;  %v1948_v49 = vpop.f32.mrf.mxu0 }
 0xa1a   : > { %v3249_v50 = vpack.i.bf16 %v1948_v49, %v3789_v46  ;;  %v3267_v49 = vld [vmem:[%s3978_s28] sm:$0xff]  }
 0xa1b   : > { %v3134_v51 = vpop.f32.mrf.mxu1  ;;  %v3141_v52 = vpop.f32.mrf.mxu0 }
 0xa1d   : > { %v1901_v53 = vpop.f32.mrf.mxu1  ;;  %v2047_v54 = vpop.f32.mrf.mxu0 }
 0xa1e   : > { %v3244_v55 = vpack.i.bf16 %v1901_v53, %v3791_v48  ;;  %v2048_v62 = vadd.f32 %v2047_v54, %v3653_v15  ;;  %v3266_v48 = vld [vmem:[%s3978_s28 + $0x8] sm:$0xff]  }
 0xa1f   : > { %v3135_v56 = vpop.f32.mrf.mxu1  ;;  %v3152_v57 = vpop.f32.mrf.mxu0 }
 0xa20   : > { %v2060_v6 = vsel %vm1327_vm13, %v2048_v62, -inf }
 0xa21   : > { %v1996_v58 = vpop.f32.mrf.mxu1  ;;  %v2050_v59 = vpop.f32.mrf.mxu0 }
 0xa22   : > { %v1997_v63 = vadd.f32 %v1996_v58, %v3653_v15  ;;  %v2051_v4 = vadd.f32 %v2050_v59, %v3656_v19 }
 0xa23   : > { %v3146_v60 = vpop.f32.mrf.mxu1  ;;  %v3153_v61 = vpop.f32.mrf.mxu0 }
 0xa24   : > { %v2054_v0 = vsel %vm1327_vm13, %v1997_v63, -inf  ;;  %v2063_v7 = vsel %vm1327_vm13, %v2051_v4, -inf }
 0xa25   : > { %2055 = vmax.xlane.f32.xlu0 %v2054_v0  ;;  %v1999_v1 = vpop.f32.mrf.mxu1 }
 0xa26   : > { %v2000_v2 = vadd.f32 %v1999_v1, %v3656_v19 }
 0xa27   : > { %v3147_v3 = vpop.f32.mrf.mxu1 }
 0xa28   : > { %v2057_v5 = vsel %vm1327_vm13, %v2000_v2, -inf }
 0xa29   : > { %2058 = vmax.xlane.f32.xlu1 %v2057_v5  ;;  %2061 = vmax.xlane.f32.xlu0 %v2060_v6 }
 0xa2d   : > { %2064 = vmax.xlane.f32.xlu0 %v2063_v7 }
 0xaae   : > { %v2056_v9 = vpop.xlane.xlu0 %2055 }
 0xaaf   : > { %v2066_v15 = vsub.f32 %v1997_v63, %v2056_v9 }
 0xab1   : > { %v2070_v21 = vmul.f32 1.442695, %v2066_v15 }
 0xab2   : > { %v2059_v11 = vpop.xlane.xlu1 %2058  ;;  %v2062_v12 = vpop.xlane.xlu0 %2061 }
 0xab3   : > { %v2068_v13 = vsub.f32 %v2048_v62, %v2062_v12  ;;  %v2067_v16 = vsub.f32 %v2000_v2, %v2059_v11 }
 0xab5   : > { %v2074_v20 = vmul.f32 1.442695, %v2068_v13  ;;  %v2072_v19 = vmul.f32 1.442695, %v2067_v16 }
 0xab6   : > { %v2065_v23 = vpop.xlane.xlu0 %2064 }
 0xab7   : > { %v2069_v24 = vsub.f32 %v2051_v4, %v2065_v23  ;;  %3322 = vpow2.f32 %v2074_v20 }
 0xab8   : > { %3324 = vpow2.f32 %v2070_v21 }
 0xab9   : > { %v2076_v25 = vmul.f32 1.442695, %v2069_v24 }
 0xabb   : > { %3326 = vpow2.f32 %v2076_v25 }
 0xabc   : > { %3328 = vpow2.f32 %v2072_v19 }
 0xac4   : > { %v3323_v26 = vpop.eup %3322 }
 0xac5   : > { %v2084_v28 = vsel %vm1327_vm13, %v3323_v26, 0.0  ;;  %v3325_v32 = vpop.eup %3324 }
 0xac6   : > { %2085 = vadd.xlane.f32.xlu1 %v2084_v28  ;;  %v2078_v38 = vsel %vm1327_vm13, %v3325_v32, 0.0 }
 0xac8   : > { %v3327_v33 = vpop.eup %3326 }
 0xac9   : > { %v2087_v35 = vsel %vm1327_vm13, %v3327_v33, 0.0  ;;  %v3329_v37 = vpop.eup %3328 }
 0xaca   : > { %2088 = vadd.xlane.f32.xlu0 %v2087_v35  ;;  %2079 = vadd.xlane.f32.xlu1 %v2078_v38  ;;  %v2081_v39 = vsel %vm1327_vm13, %v3329_v37, 0.0 }
 0xace   : > { %2082 = vadd.xlane.f32.xlu0 %v2081_v39 }
 0xadb   : > { %2100 = vrot.lane.b32.xlu1 %v3635_v8, %s3383_s1 }
 0xadf   : > { %3235 = vrot.lane.b32.xlu1 %v3234_v36, %s3384_s25 }
 0xae3   : > { %3240 = vrot.lane.b32.xlu1 %v3239_v31, %s3384_s25  ;;  %s3981_s25 = scalar_lea.vmem %s3939_s16, %s3519_s24 }
 0xae4   : > { %2147 = vrot.lane.b32.xlu0 %v3638_v10, %s3383_s1 }
 0xae7   : > { %3250 = vrot.lane.b32.xlu1 %v3249_v50, %s3385_s6 }
 0xae8   : > { %3245 = vrot.lane.b32.xlu0 %v3244_v55, %s3385_s6 }
 0xb4f   : > { %v2086_v40 = vpop.xlane.xlu1 %2085 }
 0xb50   : > { %3330 = vrcp.f32 %v2086_v40 }
 0xb53   : > { %v2089_v41 = vpop.xlane.xlu0 %2088  ;;  %v2080_v42 = vpop.xlane.xlu1 %2079 }
 0xb54   : > { %3332 = vrcp.f32 %v2089_v41 }
 0xb55   : > { %3334 = vrcp.f32 %v2080_v42  ;;  %v3354_v42 = vld [vmem:[#allocation2] sm:$0xff] }
 0xb57   : > { %v2083_v8 = vpop.xlane.xlu0 %2082  ;;  %v2101_v43 = vpop.permute.xlu1 %2100 }
 0xb58   : > { %3336 = vrcp.f32 %v2083_v8  ;;  %3155 = vmatpush3.bf16.msra.mxu1 %v2101_v43 }
 0xb59   : > { %3166 = vmatprep.subr.bf16.mxu1 %v3266_v48 }
 0xb5b   : > { %v2148_v29 = vpop.permute.xlu0 %2147  ;;  %v3236_v63 = vpop.permute.xlu1 %3235 }
 0xb5c   : > { %3161 = vmatpush3.bf16.msra.mxu0 %v2148_v29  ;;  %v3238_v0 = vunpack.i.h.bf16 %v3236_v63  ;;  %v3237_v1 = vunpack.i.l.bf16 %v3236_v63 }
 0xb5d   : > { %v3331_v27 = vpop.eup %3330 }
 0xb5e   : > { %v2096_v10 = vmul.f32 %v3331_v27, %v3323_v26  ;;  %v2243_v12 = vsel %vm1229_vm12, %v3699_v22, %v3238_v0  ;;  %v2242_v13 = vsel %vm1229_vm12, %v3695_v17, %v3237_v1 }
 0xb5f   : > { %v3241_v60 = vpop.permute.xlu1 %3240  ;;  %v3246_v62 = vpop.permute.xlu0 %3245 }
 0xb60   : > { %v3243_v2 = vunpack.i.h.bf16 %v3241_v60  ;;  %v3242_v3 = vunpack.i.l.bf16 %v3241_v60  ;;  %v3248_v7 = vunpack.i.h.bf16 %v3246_v62  ;;  %v3247_v9 = vunpack.i.l.bf16 %v3246_v62 }
 0xb61   : > { %v3333_v30 = vpop.eup %3332 }
 0xb62   : > { %v2097_v31 = vmul.f32 %v3333_v30, %v3327_v33  ;;  %v3335_v34 = vpop.eup %3334  ;;  %v2245_v16 = vsel %vm1229_vm12, %v3697_v18, %v3243_v2  ;;  %v2244_v20 = vsel %vm1229_vm12, %v3693_v14, %v3242_v3  ;;  %v2247_v26 = vsel %vm1327_vm13, %v2243_v12, %v3248_v7  ;;  %v3270_v7 = vld [vmem:[%s3561_s4 + $0x18] sm:$0xff]  }
 0xb63   : > { %v2094_v45 = vmul.f32 %v3335_v34, %v3325_v32  ;;  %v3251_v61 = vpop.permute.xlu1 %3250  ;;  %v2246_v22 = vsel %vm1327_vm13, %v2242_v13, %v3247_v9  ;;  %v3356_v34 = vld [vmem:[#allocation2 + $0x8] sm:$0xff] }
 0xb64   : > { %v2099_v36 = vpack.c.bf16 %v2097_v31, %v2096_v10  ;;  %v3253_v5 = vunpack.i.h.bf16 %v3251_v61  ;;  %v3252_v6 = vunpack.i.l.bf16 %v3251_v61  ;;  %v3355_v10 = vld [vmem:[#allocation2 + $0x10] sm:$0xff] }
 0xb65   : > { %v3337_v44 = vpop.eup %3336 }
 0xb66   : > { %3163 = vmatmul.mubr.msk.bf16.vlgmr.msra.gmra.mxu0 %vm1327_vm13, %v2099_v36  ;;  %v2095_v46 = vmul.f32 %v3337_v44, %v3329_v37  ;;  %v2248_v23 = vsel %vm1327_vm13, %v2244_v20, %v3252_v6  ;;  %v2249_v24 = vsel %vm1327_vm13, %v2245_v16, %v3253_v5  ;;  %v2943_v37 = vld [vmem:[%s3979_s0] ss:$0 sm:$0xff]  ;;  %v3268_v5 = vld [vmem:[%s3551_s11 + $0x8] sm:$0xff]  }
 0xb67   : > { %v3269_v6 = vld [vmem:[%s3551_s11] sm:$0xff]   ;;  %3174 = vmatprep.subr.bf16.mxu0 %v3268_v5 }
 0xb68   : > { %v2098_v47 = vpack.c.bf16 %v2095_v46, %v2094_v45  ;;  %v3357_v46 = vld [vmem:[#allocation2 + $0x18] sm:$0xff]  ;;  %3175 = vmatpush3.bf16.msra.mxu0 %v3268_v5 }
 0xb69   : > { %3176 = vmatprep.subr.bf16.mxu0 %v3269_v6 }
 0xb6a   : > { %3157 = vmatmul.mubr.msk.bf16.vlgmr.msra.gmra.mxu1 %vm1327_vm13, %v2098_v47 }
 0xb6b   : > { %3167 = vmatpush3.bf16.msra.mxu1 %v3266_v48 }
 0xb6c   : > { %3168 = vmatprep.subr.bf16.mxu1 %v3267_v49  ;;  %3177 = vmatpush3.bf16.msra.mxu0 %v3269_v6 }
 0xb6f   : > { %3169 = vmatpush3.bf16.msra.mxu1 %v3267_v49 }
 0xb70   : > { %3182 = vmatprep.subr.bf16.mxu1 %v3270_v7 }
 0xc26   : > { %v2187_v50 = vpop.f32.mrf.mxu0 }
 0xc28   : > { %v3164_v51 = vpop.f32.mrf.mxu0 }
 0xc2a   : > { %v2140_v52 = vpop.f32.mrf.mxu1  ;;  %v2190_v53 = vpop.f32.mrf.mxu0 }
 0xc2b   : > { %v3259_v54 = vpack.i.bf16 %v2190_v53, %v2187_v50 }
 0xc2c   : > { %v3158_v55 = vpop.f32.mrf.mxu1  ;;  %v3165_v56 = vpop.f32.mrf.mxu0 }
 0xc2d   : > { %3260 = vrot.lane.b32.xlu1 %v3259_v54, %s3386_s3 }
 0xc2e   : > { %v2143_v57 = vpop.f32.mrf.mxu1 }
 0xc2f   : > { %v3254_v58 = vpack.i.bf16 %v2143_v57, %v2140_v52 }
 0xc30   : > { %v3159_v59 = vpop.f32.mrf.mxu1 }
 0xc31   : > { %3255 = vrot.lane.b32.xlu0 %v3254_v58, %s3386_s3 }
 0xc9f   : > { %v3261_v4 = vpop.permute.xlu1 %3260 }
 0xca0   : > { %v3263_v15 = vunpack.i.h.bf16 %v3261_v4  ;;  %v3262_v11 = vunpack.i.l.bf16 %v3261_v4 }
 0xca2   : > { %v2254_v28 = vsel %vm2250_vm14, %v2249_v24, %v3263_v15  ;;  %v2253_v17 = vsel %vm2250_vm14, %v2248_v23, %v3262_v11 }
 0xca3   : > { %v3256_v21 = vpop.permute.xlu0 %3255  ;;  %v2256_v35 = vpack.c.bf16 %v2254_v28, %v2253_v17  ;;  %v2948_v28 = vld [vmem:[%s3980_s27] ss:$0 sm:$0xff]  ;;  %s3983_s27 = sld [smem:[#allocation15_spill]] (!%p2964_p5) }
 0xca4   : > { %v3258_v19 = vunpack.i.h.bf16 %v3256_v21  ;;  %v3257_v25 = vunpack.i.l.bf16 %v3256_v21 }
 0xca6   : > { %v2251_v32 = vsel %vm2250_vm14, %v2246_v22, %v3257_v25  ;;  %v2252_v33 = vsel %vm2250_vm14, %v2247_v26, %v3258_v19 }
 0xca7   : > { %v2255_v18 = vpack.c.bf16 %v2252_v33, %v2251_v32 }
 0xca9   : > { %3170 = vmatprep.mubr.msk.bf16.mxu1 %vm1166_vm10, %v2255_v18 }
 0xcaa   : > { %3171 = vmatmul.mubr.msk.bf16.vlgmr.msra.gmra.mxu1 %vm1166_vm10, %v2256_v35 }
 0xcab   : > { %3183 = vmatpush3.bf16.msra.mxu1 %v3270_v7 }
 0xd6a   : > { %v3172_v14 = vpop.f32.mrf.mxu1 }
 0xd6b   : > { %v2329_v39 = vadd.f32 %v3172_v14, %v2943_v37  ;;  %v2949_v14 = vld [vmem:[%s3981_s25] ss:$0 sm:$0xff]  ;;  %s3984_s25 = sld [smem:[#allocation18_spill]] (!%p2964_p5) }
 0xd6c   : > { %v2320_v38 = vpop.f32.mrf.mxu1 }
 0xd6d   : > { %v2321_v40 = vadd.f32 %v2943_v37, %v2320_v38  ;;  %v2337_v31 = vadd.f32 %v3355_v10, %v2329_v39  ;;  %v3271_v10 = vld [vmem:[%s3561_s4 + $0x10] sm:$0xff]  }
 0xd6e   : > { %v3173_v41 = vpop.f32.mrf.mxu1  ;;  %3184 = vmatprep.subr.bf16.mxu1 %v3271_v10 }
 0xd6f   : > { %v2335_v8 = vadd.f32 %v3354_v42, %v2321_v40  ;;  %v2332_v29 = vadd.f32 %v3173_v41, %v2943_v37  ;;  %v2345_v45 = vsel %vm1166_vm10, %v2337_v31, 0.0  ;;  %3185 = vmatpush3.bf16.msra.mxu1 %v3271_v10 }
 0xd70   : > { %v2323_v43 = vpop.f32.mrf.mxu1 }
 0xd71   : > { %v2324_v27 = vadd.f32 %v2943_v37, %v2323_v43  ;;  %v2339_v30 = vsel %vm1166_vm10, %v2335_v8, 0.0  ;;  %v2338_v47 = vadd.f32 %v3357_v46, %v2332_v29 }
 0xd72   : > { %2340 = vadd.xlane.f32.xlu0 %v2339_v30 }
 0xd73   : > { %v2336_v36 = vadd.f32 %v3356_v34, %v2324_v27  ;;  %v2348_v48 = vsel %vm1166_vm10, %v2338_v47, 0.0  ;;  %v3273_v34 = vld [vmem:[%s3561_s4] sm:$0xff]  }
 0xd75   : > { %v2342_v44 = vsel %vm1166_vm10, %v2336_v36, 0.0 }
 0xd76   : > { %2343 = vadd.xlane.f32.xlu1 %v2342_v44  ;;  %2346 = vadd.xlane.f32.xlu0 %v2345_v45  ;;  %v2950_v45 = vld [vmem:[%s853_s13] ss:$0 sm:$0xff] }
 0xd7a   : > { %2349 = vadd.xlane.f32.xlu0 %v2348_v48 }
 0xdfb   : > { %v2341_v49 = vpop.xlane.xlu0 %2340 }
 0xdfc   : > { %v2352_v50 = vmul.f32 0.03125, %v2341_v49 }
 0xdfe   : > { %v2356_v51 = vsub.f32 %v2335_v8, %v2352_v50 }
 0xdff   : > { %v2344_v52 = vpop.xlane.xlu1 %2343  ;;  %v2347_v53 = vpop.xlane.xlu0 %2346 }
 0xe00   : > { %v2353_v54 = vmul.f32 0.03125, %v2344_v52  ;;  %v2354_v55 = vmul.f32 0.03125, %v2347_v53  ;;  %v2360_v56 = vmul.f32 %v2356_v51, %v2356_v51 }
 0xe02   : > { %v2357_v57 = vsub.f32 %v2336_v36, %v2353_v54  ;;  %v2358_v58 = vsub.f32 %v2337_v31, %v2354_v55  ;;  %v2364_v59 = vsel %vm1166_vm10, %v2360_v56, 0.0  ;;  %v3272_v31 = vld [vmem:[%s3561_s4 + $0x8] sm:$0xff]  }
 0xe03   : > { %2365 = vadd.xlane.f32.xlu1 %v2364_v59  ;;  %v2350_v63 = vpop.xlane.xlu0 %2349  ;;  %3186 = vmatprep.subr.bf16.mxu1 %v3272_v31  ;;  %v2955_v59 = vld [vmem:[%s861_s5] ss:$0 sm:$0xff] }
 0xe04   : > { %v2355_v60 = vmul.f32 0.03125, %v2350_v63  ;;  %v2361_v61 = vmul.f32 %v2357_v57, %v2357_v57  ;;  %v2362_v62 = vmul.f32 %v2358_v58, %v2358_v58  ;;  %3187 = vmatpush3.bf16.msra.mxu1 %v3272_v31 }
 0xe05   : > { %3188 = vmatprep.subr.bf16.mxu1 %v3273_v34 }
 0xe06   : > { %v2359_v0 = vsub.f32 %v2338_v47, %v2355_v60  ;;  %v2367_v1 = vsel %vm1166_vm10, %v2361_v61, 0.0  ;;  %v2370_v2 = vsel %vm1166_vm10, %v2362_v62, 0.0 }
 0xe07   : > { %2368 = vadd.xlane.f32.xlu0 %v2367_v1  ;;  %2371 = vadd.xlane.f32.xlu1 %v2370_v2 }
 0xe08   : > { %v2363_v3 = vmul.f32 %v2359_v0, %v2359_v0  ;;  %3189 = vmatpush3.bf16.msra.mxu1 %v3273_v34 }
 0xe0a   : > { %v2373_v4 = vsel %vm1166_vm10, %v2363_v3, 0.0 }
 0xe0b   : > { %2374 = vadd.xlane.f32.xlu0 %v2373_v4 }
 0xe8c   : > { %v2366_v9 = vpop.xlane.xlu1 %2365 }
 0xe8d   : > { %v2376_v15 = vmul.f32 0.03125, %v2366_v9 }
 0xe8f   : > { %v2380_v11 = vadd.f32 1e-05, %v2376_v15 }
 0xe90   : > { %v2372_v12 = vpop.xlane.xlu1 %2371  ;;  %v2369_v13 = vpop.xlane.xlu0 %2368 }
 0xe91   : > { %3338 = vrsqrt.f32 %v2380_v11  ;;  %v2378_v16 = vmul.f32 0.03125, %v2372_v12  ;;  %v2377_v20 = vmul.f32 0.03125, %v2369_v13 }
 0xe93   : > { %v2382_v21 = vadd.f32 1e-05, %v2378_v16  ;;  %v2381_v23 = vadd.f32 1e-05, %v2377_v20 }
 0xe94   : > { %v2375_v24 = vpop.xlane.xlu0 %2374 }
 0xe95   : > { %3340 = vrsqrt.f32 %v2382_v21  ;;  %v2379_v19 = vmul.f32 0.03125, %v2375_v24 }
 0xe96   : > { %3342 = vrsqrt.f32 %v2381_v23 }
 0xe97   : > { %v2383_v25 = vadd.f32 1e-05, %v2379_v19 }
 0xe99   : > { %3344 = vrsqrt.f32 %v2383_v25 }
 0xe9e   : > { %v3339_v26 = vpop.eup %3338 }
 0xe9f   : > { %v2388_v22 = vmul.f32 %v3339_v26, %v2356_v51 }
 0xea1   : > { %v2399_v35 = vmul.f32 %v2948_v28, %v2388_v22 }
 0xea2   : > { %v3341_v17 = vpop.eup %3340 }
 0xea3   : > { %v3343_v32 = vpop.eup %3342  ;;  %v2390_v33 = vmul.f32 %v3341_v17, %v2358_v58  ;;  %v2410_v41 = vadd.f32 %v2949_v14, %v2399_v35 }
 0xea4   : > { %v2389_v18 = vmul.f32 %v3343_v32, %v2357_v57 }
 0xea5   : > { %v2401_v40 = vmul.f32 %v2948_v28, %v2390_v33 }
 0xea6   : > { %v3345_v37 = vpop.eup %3344  ;;  %v2400_v38 = vmul.f32 %v2948_v28, %v2389_v18 }
 0xea7   : > { %v2391_v39 = vmul.f32 %v3345_v37, %v2359_v0  ;;  %v2412_v29 = vadd.f32 %v2949_v14, %v2401_v40 }
 0xea8   : > { %v2411_v42 = vadd.f32 %v2949_v14, %v2400_v38 }
 0xea9   : > { %v2402_v8 = vmul.f32 %v2948_v28, %v2391_v39 }
 0xeaa   : > { %v2414_v43 = vpack.c.bf16 %v2411_v42, %v2410_v41 }
 0xeab   : > { %v2413_v27 = vadd.f32 %v2949_v14, %v2402_v8 }
 0xeac   : > { %3178 = vmatprep.mubr.msk.bf16.mxu0 %vm1166_vm10, %v2414_v43 }
 0xead   : > { %v2415_v30 = vpack.c.bf16 %v2413_v27, %v2412_v29 }
 0xeaf   : > { %3179 = vmatmul.mubr.msk.bf16.vlgmr.msra.gmra.mxu0 %vm1166_vm10, %v2415_v30 }
 0xf6f   : > { %v3180_v36 = vpop.f32.mrf.mxu0 }
 0xf70   : > { %v2488_v49 = vadd.f32 %v3180_v36, %v2950_v45 }
 0xf71   : > { %v2479_v44 = vpop.f32.mrf.mxu0 }
 0xf72   : > { %v2480_v47 = vadd.f32 %v2950_v45, %v2479_v44  ;;  %v2496_v55 = vmax.f32 %v2488_v49, 0.0  ;;  %v2962_v44 = vld [vmem:[%s864_s2] ss:$0 sm:$0xff]  ;;  %s3982_s2 = sld [smem:[#allocation14_spill]] (!%p2964_p5) }
 0xf73   : > { %v3181_v46 = vpop.f32.mrf.mxu0 }
 0xf74   : > { %v2491_v48 = vadd.f32 %v3181_v46, %v2950_v45  ;;  %v2494_v53 = vmax.f32 %v2480_v47, 0.0  ;;  %v2963_v46 = vld [vmem:[%s867_s9] ss:$0 sm:$0xff] }
 0xf75   : > { %v2482_v50 = vpop.f32.mrf.mxu0 }
 0xf76   : > { %v2483_v51 = vadd.f32 %v2950_v45, %v2482_v50  ;;  %v2497_v52 = vmax.f32 %v2491_v48, 0.0 }
 0xf78   : > { %v2495_v54 = vmax.f32 %v2483_v51, 0.0  ;;  %v2499_v57 = vpack.c.bf16 %v2497_v52, %v2496_v55 }
 0xf7a   : > { %v2498_v56 = vpack.c.bf16 %v2495_v54, %v2494_v53 }
 0xf7c   : > { %3190 = vmatprep.mubr.msk.bf16.mxu1 %vm2539_vm15, %v2498_v56 }
 0xf7d   : > { %3191 = vmatmul.mubr.msk.bf16.vlgmr.msra.gmra.mxu1 %vm2539_vm15, %v2499_v57 }
0x103d   : > { %v3192_v58 = vpop.f32.mrf.mxu1 }
0x103e   : > { %v2589_v60 = vadd.f32 %v3192_v58, %v2955_v59 }
0x103f   : > { %v2580_v63 = vpop.f32.mrf.mxu1 }
0x1040   : > { %v2581_v61 = vadd.f32 %v2955_v59, %v2580_v63  ;;  %v2597_v5 = vadd.f32 %v2589_v60, %v2412_v29 }
0x1041   : > { %v3193_v62 = vpop.f32.mrf.mxu1 }
0x1042   : > { %v2595_v0 = vadd.f32 %v2581_v61, %v2410_v41  ;;  %v2592_v2 = vadd.f32 %v3193_v62, %v2955_v59  ;;  %v2605_v9 = vsel %vm1166_vm10, %v2597_v5, 0.0 }
0x1043   : > { %v2583_v1 = vpop.f32.mrf.mxu1 }
0x1044   : > { %v2584_v3 = vadd.f32 %v2955_v59, %v2583_v1  ;;  %v2599_v4 = vsel %vm1166_vm10, %v2595_v0, 0.0  ;;  %v2598_v15 = vadd.f32 %v2592_v2, %v2413_v27 }
0x1045   : > { %2600 = vadd.xlane.f32.xlu1 %v2599_v4 }
0x1046   : > { %v2596_v6 = vadd.f32 %v2584_v3, %v2411_v42  ;;  %v2608_v11 = vsel %vm1166_vm10, %v2598_v15, 0.0 }
0x1048   : > { %v2602_v7 = vsel %vm1166_vm10, %v2596_v6, 0.0 }
0x1049   : > { %2603 = vadd.xlane.f32.xlu0 %v2602_v7  ;;  %2606 = vadd.xlane.f32.xlu1 %v2605_v9 }
0x104d   : > { %2609 = vadd.xlane.f32.xlu0 %v2608_v11 }
0x10ce   : > { %v2601_v12 = vpop.xlane.xlu1 %2600 }
0x10cf   : > { %v2611_v13 = vmul.f32 0.03125, %v2601_v12 }
0x10d1   : > { %v2615_v16 = vsub.f32 %v2595_v0, %v2611_v13 }
0x10d2   : > { %v2604_v20 = vpop.xlane.xlu0 %2603  ;;  %v2607_v21 = vpop.xlane.xlu1 %2606 }
0x10d3   : > { %v2612_v23 = vmul.f32 0.03125, %v2604_v20  ;;  %v2613_v24 = vmul.f32 0.03125, %v2607_v21  ;;  %v2619_v19 = vmul.f32 %v2615_v16, %v2615_v16 }
0x10d5   : > { %v2616_v25 = vsub.f32 %v2596_v6, %v2612_v23  ;;  %v2617_v26 = vsub.f32 %v2597_v5, %v2613_v24  ;;  %v2623_v22 = vsel %vm1166_vm10, %v2619_v19, 0.0 }
0x10d6   : > { %v2610_v28 = vpop.xlane.xlu0 %2609  ;;  %2624 = vadd.xlane.f32.xlu1 %v2623_v22 }
0x10d7   : > { %v2614_v17 = vmul.f32 0.03125, %v2610_v28  ;;  %v2620_v32 = vmul.f32 %v2616_v25, %v2616_v25  ;;  %v2621_v33 = vmul.f32 %v2617_v26, %v2617_v26 }
0x10d9   : > { %v2618_v18 = vsub.f32 %v2598_v15, %v2614_v17  ;;  %v2626_v35 = vsel %vm1166_vm10, %v2620_v32, 0.0  ;;  %v2629_v14 = vsel %vm1166_vm10, %v2621_v33, 0.0 }
0x10da   : > { %2627 = vadd.xlane.f32.xlu0 %v2626_v35  ;;  %2630 = vadd.xlane.f32.xlu1 %v2629_v14 }
0x10db   : > { %v2622_v37 = vmul.f32 %v2618_v18, %v2618_v18 }
0x10dd   : > { %v2632_v38 = vsel %vm1166_vm10, %v2622_v37, 0.0 }
0x10de   : > { %2633 = vadd.xlane.f32.xlu0 %v2632_v38 }
0x115f   : > { %v2625_v39 = vpop.xlane.xlu1 %2624 }
0x1160   : > { %v2635_v40 = vmul.f32 0.03125, %v2625_v39 }
0x1162   : > { %v2639_v41 = vadd.f32 1e-05, %v2635_v40 }
0x1163   : > { %v2628_v42 = vpop.xlane.xlu0 %2627  ;;  %v2631_v8 = vpop.xlane.xlu1 %2630 }
0x1164   : > { %3346 = vrsqrt.f32 %v2639_v41  ;;  %v2636_v43 = vmul.f32 0.03125, %v2628_v42  ;;  %v2637_v29 = vmul.f32 0.03125, %v2631_v8 }
0x1166   : > { %v2640_v27 = vadd.f32 1e-05, %v2636_v43  ;;  %v2641_v30 = vadd.f32 1e-05, %v2637_v29 }
0x1167   : > { %v2634_v10 = vpop.xlane.xlu0 %2633 }
0x1168   : > { %3348 = vrsqrt.f32 %v2640_v27  ;;  %v2638_v31 = vmul.f32 0.03125, %v2634_v10 }
0x1169   : > { %3350 = vrsqrt.f32 %v2641_v30 }
0x116a   : > { %v2642_v34 = vadd.f32 1e-05, %v2638_v31 }
0x116c   : > { %3352 = vrsqrt.f32 %v2642_v34 }
0x1171   : > { %v3347_v36 = vpop.eup %3346 }
0x1172   : > { %v2647_v45 = vmul.f32 %v3347_v36, %v2615_v16 }
0x1174   : > { %v2658_v47 = vmul.f32 %v2962_v44, %v2647_v45 }
0x1175   : > { %v3349_v48 = vpop.eup %3348 }
0x1176   : > { %v3351_v49 = vpop.eup %3350  ;;  %v2669_v50 = vadd.f32 %v2963_v46, %v2658_v47  ;;  %v2648_v51 = vmul.f32 %v3349_v48, %v2616_v25 }
0x1177   : > { %v2649_v52 = vmul.f32 %v3351_v49, %v2617_v26 }
0x1178   : > { %2673 = vst.msk [vmem:[#allocation2] sm:$0xff] %vm1166_vm10, %v2669_v50  ;;  %v2659_v53 = vmul.f32 %v2962_v44, %v2648_v51 }
0x1179   : > { %v3353_v54 = vpop.eup %3352  ;;  %v2660_v55 = vmul.f32 %v2962_v44, %v2649_v52 }
0x117a   : > { %v2670_v56 = vadd.f32 %v2963_v46, %v2659_v53  ;;  %v2650_v57 = vmul.f32 %v3353_v54, %v2618_v18 }
0x117b   : > { %v2671_v58 = vadd.f32 %v2963_v46, %v2660_v55 }
0x117c   : > { %2674 = vst.msk [vmem:[#allocation2 + $0x8] sm:$0xff] %vm1166_vm10, %v2670_v56  ;;  %v2661_v59 = vmul.f32 %v2962_v44, %v2650_v57  ;;  %2680 = sbr.rel (%p2964_p5) target bundleno = 4692 (0x1254), region = 120 }
0x117d   : > { %2675 = vst.msk [vmem:[#allocation2 + $0x10] sm:$0xff] %vm1166_vm10, %v2671_v58 }
0x117e   : > { %v2672_v63 = vadd.f32 %v2963_v46, %v2661_v59 }
0x1180   : > { %2676 = vst.msk [vmem:[#allocation2 + $0x18] sm:$0xff] %vm1166_vm10, %v2672_v63 }
0x1181   : > { %v3358_v60 = vld [vmem:[%s3982_s2 + $0x8] sm:$0xff]   ;;  %v2681_v61 = vpack.c.bf16 %v2670_v56, %v2669_v50  ;;  %v3359_v62 = vld [vmem:[%s3982_s2] sm:$0xff]   ;;  %v2682_v0 = vpack.c.bf16 %v2672_v63, %v2671_v58 }
0x1182   : > { %3194 = vmatprep.subr.bf16.mxu0 %v3358_v60  ;;  %v2965_v1 = vld [vmem:[%s3983_s27] ss:$0 sm:$0xff] }
0x1183   : > { %3198 = vmatprep.mubr.msk.bf16.mxu0 %vm1166_vm10, %v2681_v61  ;;  %3195 = vmatpush3.bf16.msra.mxu0 %v3358_v60 }
0x1184   : > { %3196 = vmatprep.subr.bf16.mxu0 %v3359_v62 }
0x1187   : > { %3197 = vmatpush3.bf16.msra.mxu0 %v3359_v62 }
0x118a   : > { %3199 = vmatmul.mubr.msk.bf16.vlgmr.msra.gmra.mxu0 %vm1166_vm10, %v2682_v0 }
0x124a   : > { %v3200_v2 = vpop.f32.mrf.mxu0 }
0x124b   : > { %v2755_v3 = vadd.f32 %v3200_v2, %v2965_v1 }
0x124c   : > { %v2746_v4 = vpop.f32.mrf.mxu0 }
0x124d   : > { %2763 = vst [vmem:[%s3984_s25 + $0x10] sm:$0xff] %v2755_v3  ;;  %v2747_v5 = vadd.f32 %v2965_v1, %v2746_v4 }
0x124e   : > { %v3201_v6 = vpop.f32.mrf.mxu0 }
0x124f   : > { %2761 = vst [vmem:[%s3984_s25] sm:$0xff] %v2747_v5  ;;  %v2758_v7 = vadd.f32 %v3201_v6, %v2965_v1 }
0x1250   : > { %v2749_v9 = vpop.f32.mrf.mxu0 }
0x1251   : > { %2764 = vst [vmem:[%s3984_s25 + $0x18] sm:$0xff] %v2758_v7  ;;  %v2750_v15 = vadd.f32 %v2965_v1, %v2749_v9 }
0x1253   : > { %2762 = vst [vmem:[%s3984_s25 + $0x8] sm:$0xff] %v2750_v15 }
0x1254 PF: > { %s3985_s26 = sld [smem:[#allocation4_spill]] }
0x125a   : > { %s33_s4 = sadd.s32 1, %s3985_s26  }
0x125b   : > { %p30_p6 = scmp.ge.s32.totalorder %s33_s4, 4  }
0x125d   :  { %32 = sbr.rel (!%p30_p6) target bundleno = 14 (0xe), region = 179 }

</bundles_post_ra>
